<compile_context>
chip_gen: v7x
topology: tpu7x:2x2x1
jax: 0.10.0
libtpu: 0.0.40
codegen_flags: <defaults>
</compile_context>

<pallas_src>
import functools

import jax
import jax.numpy as jnp
from jax.experimental import pallas as pl
from jax.experimental.pallas import tpu as pltpu


# --------------------------------------------------------------------------
# Group-tile picker: largest divisor of G whose per-step block stays under a
# VMEM-friendly byte budget while keeping >= 4 grid steps when possible
# (so a "parallel" grid still feeds both v7x TensorCores).
# --------------------------------------------------------------------------
def _pick_group_tile(G, L, max_c, target_bytes=2 << 20):
    divs = [d for d in range(1, G + 1) if G % d == 0]
    fits = [d for d in divs if d * L * (L + 4 * max_c) * 4 <= target_bytes] or [1]
    for min_steps in (4, 2, 1):
        cand = [d for d in fits if G // d >= min_steps]
        if cand:
            return max(cand)
    return 1


def _batched_attention(q, k, v):
    """softmax(q k^T) v over batched groups; q/k/v are (Gt, L, D) f32."""
    bf16 = jnp.bfloat16
    s = jnp.einsum("gld,gmd->glm", q.astype(bf16), k.astype(bf16),
                   preferred_element_type=jnp.float32)
    s = s - jnp.max(s, axis=-1, keepdims=True)
    e = jnp.exp(s)
    attn = e * pl.reciprocal(jnp.sum(e, axis=-1, keepdims=True), approx=True)
    return jnp.einsum("glm,gmd->gld", attn.astype(bf16), v.astype(bf16),
                      preferred_element_type=jnp.float32)


# --------------------------------------------------------------------------
# Kernel 1: conv_down + bn1 + relu + fused col-QKV + batched ColAttention
#   block: (Gt, H, Cin) with groups = (b, w), sequence axis = H
# --------------------------------------------------------------------------
def _col_block_kernel(x_ref, wd_ref, s1_ref, b1_ref, wqkv_ref, bqkv_ref,
                      gamma_ref, o_ref, *, planes):
    gt, L, cin = x_ref.shape
    bf16 = jnp.bfloat16

    x = x_ref[...].astype(bf16).reshape(gt * L, cin)
    # conv_down (1x1) + folded BN + ReLU for the whole group block (big-M matmul)
    t = jnp.dot(x, wd_ref[...], preferred_element_type=jnp.float32)
    t = jnp.maximum(t * s1_ref[...] + b1_ref[...], 0.0)                  # (gt*L, P) f32

    # single fused Q/K/V projection: (gt*L, P) @ (P, 3P)
    qkv = jnp.dot(t.astype(bf16), wqkv_ref[...],
                  preferred_element_type=jnp.float32) + bqkv_ref[...]
    q = qkv[:, :planes].reshape(gt, L, planes)
    k = qkv[:, planes:2 * planes].reshape(gt, L, planes)
    v = qkv[:, 2 * planes:].reshape(gt, L, planes)

    o = _batched_attention(q, k, v)                                      # (gt, L, P)
    o_ref[...] = gamma_ref[0, 0] * o + t.reshape(gt, L, planes)


def col_block(x3, p):
    G, L, cin = x3.shape
    planes = p["w_down"].shape[1]
    gt = _pick_group_tile(G, L, max(cin, 3 * planes))
    kernel = functools.partial(_col_block_kernel, planes=planes)
    return pl.pallas_call(
        kernel,
        out_shape=jax.ShapeDtypeStruct((G, L, planes), jnp.float32),
        grid_spec=pltpu.PrefetchScalarGridSpec(
            num_scalar_prefetch=0,
            grid=(G // gt,),
            in_specs=[
                pl.BlockSpec((gt, L, cin), lambda g: (g, 0, 0)),
                pl.BlockSpec((cin, planes), lambda g: (0, 0)),
                pl.BlockSpec((1, planes), lambda g: (0, 0)),
                pl.BlockSpec((1, planes), lambda g: (0, 0)),
                pl.BlockSpec((planes, 3 * planes), lambda g: (0, 0)),
                pl.BlockSpec((1, 3 * planes), lambda g: (0, 0)),
                pl.BlockSpec((1, 1), lambda g: (0, 0)),
            ],
            out_specs=pl.BlockSpec((gt, L, planes), lambda g: (g, 0, 0)),
        ),
        compiler_params=pltpu.CompilerParams(
            dimension_semantics=("parallel",)),
    )(x3, p["w_down"], p["bn1_scale"], p["bn1_shift"],
      p["col_wqkv"], p["col_bqkv"], p["col_gamma"])


# --------------------------------------------------------------------------
# Kernel 2: fused row-QKV + batched RowAttention + relu + conv_up + bn2
#           + identity + relu
#   block: (Gt, W, P) with groups = (b, h), sequence axis = W
# --------------------------------------------------------------------------
def _row_block_kernel(x_ref, id_ref, wqkv_ref, bqkv_ref, gamma_ref,
                      wu_ref, s2_ref, b2_ref, o_ref, *, planes):
    gt, L, _ = x_ref.shape
    bf16 = jnp.bfloat16

    x2 = x_ref[...].reshape(gt * L, planes)                              # f32 residual

    qkv = jnp.dot(x2.astype(bf16), wqkv_ref[...],
                  preferred_element_type=jnp.float32) + bqkv_ref[...]
    q = qkv[:, :planes].reshape(gt, L, planes)
    k = qkv[:, planes:2 * planes].reshape(gt, L, planes)
    v = qkv[:, 2 * planes:].reshape(gt, L, planes)

    o = _batched_attention(q, k, v).reshape(gt * L, planes)
    y = gamma_ref[0, 0] * o + x2                                         # RowAttention out
    y = jnp.maximum(y, 0.0)                                              # relu

    t = jnp.dot(y.astype(bf16), wu_ref[...],
                preferred_element_type=jnp.float32)                      # conv_up (1x1)
    t = t * s2_ref[...] + b2_ref[...]                                    # bn2 (folded)
    t = t + id_ref[...].reshape(gt * L, 2 * planes)                      # + identity
    o_ref[...] = jnp.maximum(t, 0.0).reshape(gt, L, 2 * planes)


def row_block(x3, id3, p):
    G, L, planes = x3.shape
    cout = 2 * planes
    gt = _pick_group_tile(G, L, max(cout, 3 * planes))
    kernel = functools.partial(_row_block_kernel, planes=planes)
    return pl.pallas_call(
        kernel,
        out_shape=jax.ShapeDtypeStruct((G, L, cout), jnp.float32),
        grid_spec=pltpu.PrefetchScalarGridSpec(
            num_scalar_prefetch=0,
            grid=(G // gt,),
            in_specs=[
                pl.BlockSpec((gt, L, planes), lambda g: (g, 0, 0)),
                pl.BlockSpec((gt, L, cout), lambda g: (g, 0, 0)),
                pl.BlockSpec((planes, 3 * planes), lambda g: (0, 0)),
                pl.BlockSpec((1, 3 * planes), lambda g: (0, 0)),
                pl.BlockSpec((1, 1), lambda g: (0, 0)),
                pl.BlockSpec((planes, cout), lambda g: (0, 0)),
                pl.BlockSpec((1, cout), lambda g: (0, 0)),
                pl.BlockSpec((1, cout), lambda g: (0, 0)),
            ],
            out_specs=pl.BlockSpec((gt, L, cout), lambda g: (g, 0, 0)),
        ),
        compiler_params=pltpu.CompilerParams(
            dimension_semantics=("parallel",)),
    )(x3, id3, p["row_wqkv"], p["row_bqkv"], p["row_gamma"],
      p["w_up"], p["bn2_scale"], p["bn2_shift"])


# --------------------------------------------------------------------------
# Full AxialBlock_dynamic forward (stride=1, downsample=None)
# --------------------------------------------------------------------------
def axial_block_dynamic(x_nchw, p):
    B, Cin, H, W = x_nchw.shape
    P = p["w_down"].shape[1]                       # planes
    assert Cin == 2 * P, "downsample=None requires inplanes == planes * expansion"

    # ---- column-attention path: (B, W, H, C) layout, groups = (b, w) ----
    x_col = jnp.transpose(x_nchw, (0, 3, 2, 1)).astype(jnp.bfloat16)   # (B, W, H, Cin)
    oc_col = col_block(x_col.reshape(B * W, H, Cin), p)                # (B*W, H, P) f32

    # ---- row-attention path: natural (B, H, W, C) layout, groups = (b, h) ----
    oc = jnp.transpose(oc_col.reshape(B, W, H, P), (0, 2, 1, 3))       # (B, H, W, P)
    x_id = jnp.transpose(x_nchw, (0, 2, 3, 1))                         # (B, H, W, Cin) f32
    out = row_block(oc.reshape(B * H, W, P),
                    x_id.reshape(B * H, W, Cin), p)                    # (B*H, W, 2P)

    out = out.reshape(B, H, W, 2 * P)
    return jnp.transpose(out, (0, 3, 1, 2))                            # back to NCHW


# --------------------------------------------------------------------------
# Deterministic parameter construction (synthetic, not a checkpoint)
# --------------------------------------------------------------------------
def make_params(key, inplanes, planes, eps=1e-5):
    ks = jax.random.split(key, 6)

    def bn_fold(k, c):
        kg, kb, km, kv = jax.random.split(k, 4)
        gamma = 0.5 + jax.random.uniform(kg, (c,), jnp.float32)
        beta = 0.1 * jax.random.normal(kb, (c,), jnp.float32)
        mean = 0.1 * jax.random.normal(km, (c,), jnp.float32)
        var = 0.5 + jax.random.uniform(kv, (c,), jnp.float32)
        scale = gamma / jnp.sqrt(var + eps)
        shift = beta - mean * scale
        return scale.reshape(1, c), shift.reshape(1, c)

    def attn_params(k, d, gamma_val):
        kq, kk, kv, kb = jax.random.split(k, 4)
        s = 1.0 / jnp.sqrt(d)
        wqkv = jnp.concatenate(
            [s * jax.random.normal(kq, (d, d), jnp.float32),
             s * jax.random.normal(kk, (d, d), jnp.float32),
             s * jax.random.normal(kv, (d, d), jnp.float32)], axis=1)
        bqkv = 0.05 * jax.random.normal(kb, (1, 3 * d), jnp.float32)
        # torch init is gamma=0 (identity); use nonzero to exercise the path.
        return (wqkv.astype(jnp.bfloat16), bqkv,
                jnp.full((1, 1), gamma_val, jnp.float32))

    bn1_scale, bn1_shift = bn_fold(ks[2], planes)
    bn2_scale, bn2_shift = bn_fold(ks[3], planes * 2)
    col_wqkv, col_bqkv, col_gamma = attn_params(ks[4], planes, 0.3)
    row_wqkv, row_bqkv, row_gamma = attn_params(ks[5], planes, 0.7)

    return {
        "w_down": ((1.0 / jnp.sqrt(inplanes)) *
                   jax.random.normal(ks[0], (inplanes, planes), jnp.float32)
                   ).astype(jnp.bfloat16),
        "w_up": ((1.0 / jnp.sqrt(planes)) *
                 jax.random.normal(ks[1], (planes, planes * 2), jnp.float32)
                 ).astype(jnp.bfloat16),
        "bn1_scale": bn1_scale, "bn1_shift": bn1_shift,
        "bn2_scale": bn2_scale, "bn2_shift": bn2_shift,
        "col_wqkv": col_wqkv, "col_bqkv": col_bqkv, "col_gamma": col_gamma,
        "row_wqkv": row_wqkv, "row_bqkv": row_bqkv, "row_gamma": row_gamma,
    }


if __name__ == "__main__":
    key = jax.random.PRNGKey(0)
    kx, kp = jax.random.split(key)

    B, H, W = 2, 16, 16
    planes = 8
    inplanes = planes * 2          # expansion = 2 (so the residual add is valid)

    x = jax.random.normal(kx, (B, inplanes, H, W), jnp.float32)   # NCHW like PyTorch
    params = make_params(kp, inplanes, planes)

    out = jax.jit(axial_block_dynamic)(x, params)
    out = jax.block_until_ready(out)
    assert out.shape == (B, planes * 2, H, W)
    assert bool(jnp.all(jnp.isfinite(out)))
    print("KERNEL_OK")
</pallas_src>

<mosaic_0001>
module attributes {stable_mosaic.version = 11 : i64} {
  func.func @_col_block_kernel(%arg0: i32, %arg1: memref<8x16x16xbf16, #tpu.memory_space<vmem>>, %arg2: memref<16x8xbf16, #tpu.memory_space<vmem>>, %arg3: memref<1x8xf32, #tpu.memory_space<vmem>>, %arg4: memref<1x8xf32, #tpu.memory_space<vmem>>, %arg5: memref<8x24xbf16, #tpu.memory_space<vmem>>, %arg6: memref<1x24xf32, #tpu.memory_space<vmem>>, %arg7: memref<1x1xf32, #tpu.memory_space<vmem>>, %arg8: memref<8x16x8xf32, #tpu.memory_space<vmem>>) attributes {dimension_semantics = [#tpu.dimension_semantics<parallel>], iteration_bounds = array<i64: 4>, scalar_prefetch = 0 : i64, scratch_operands = 0 : i64, tpu.core_type = #tpu.core_type<tc>, window_params = [{transform_indices = @transform_0, window_bounds = array<i64: 8, 16, 16>}, {pipeline_mode = #tpu.pipeline_mode<synchronous>, transform_indices = @transform_1, window_bounds = array<i64: 16, 8>}, {pipeline_mode = #tpu.pipeline_mode<synchronous>, transform_indices = @transform_2, window_bounds = array<i64: 1, 8>}, {pipeline_mode = #tpu.pipeline_mode<synchronous>, transform_indices = @transform_3, window_bounds = array<i64: 1, 8>}, {pipeline_mode = #tpu.pipeline_mode<synchronous>, transform_indices = @transform_4, window_bounds = array<i64: 8, 24>}, {pipeline_mode = #tpu.pipeline_mode<synchronous>, transform_indices = @transform_5, window_bounds = array<i64: 1, 24>}, {pipeline_mode = #tpu.pipeline_mode<synchronous>, transform_indices = @transform_6, window_bounds = array<i64: 1, 1>}, {transform_indices = @transform_7, window_bounds = array<i64: 8, 16, 8>}]} {
    %c0 = arith.constant 0 : index
    %c0_0 = arith.constant 0 : index
    %c0_1 = arith.constant 0 : index
    %0 = vector.load %arg1[%c0, %c0_0, %c0_1] : memref<8x16x16xbf16, #tpu.memory_space<vmem>>, vector<8x16x16xbf16>
    %1 = vector.shape_cast %0 : vector<8x16x16xbf16> to vector<128x16xbf16>
    %c0_2 = arith.constant 0 : index
    %c0_3 = arith.constant 0 : index
    %2 = vector.load %arg2[%c0_2, %c0_3] : memref<16x8xbf16, #tpu.memory_space<vmem>>, vector<16x8xbf16>
    %cst = arith.constant dense<0.000000e+00> : vector<128x8xf32>
    %3 = tpu.matmul %1, %2, %cst {dimension_numbers = #tpu.dot_dimension_numbers<[1], [0], [0], [1], [0, 0, 1, 1], [], []>} : vector<128x16xbf16>, vector<16x8xbf16>, vector<128x8xf32> -> vector<128x8xf32>
    %c0_4 = arith.constant 0 : index
    %c0_5 = arith.constant 0 : index
    %4 = vector.load %arg3[%c0_4, %c0_5] : memref<1x8xf32, #tpu.memory_space<vmem>>, vector<1x8xf32>
    %5 = vector.broadcast %4 : vector<1x8xf32> to vector<128x8xf32>
    %6 = arith.mulf %3, %5 : vector<128x8xf32>
    %c0_6 = arith.constant 0 : index
    %c0_7 = arith.constant 0 : index
    %7 = vector.load %arg4[%c0_6, %c0_7] : memref<1x8xf32, #tpu.memory_space<vmem>>, vector<1x8xf32>
    %8 = vector.broadcast %7 : vector<1x8xf32> to vector<128x8xf32>
    %9 = arith.addf %6, %8 : vector<128x8xf32>
    %cst_8 = arith.constant 0.000000e+00 : f32
    %10 = vector.broadcast %cst_8 : f32 to vector<128x8xf32>
    %11 = arith.maximumf %9, %10 : vector<128x8xf32>
    %12 = arith.truncf %11 : vector<128x8xf32> to vector<128x8xbf16>
    %c0_9 = arith.constant 0 : index
    %c0_10 = arith.constant 0 : index
    %13 = vector.load %arg5[%c0_9, %c0_10] : memref<8x24xbf16, #tpu.memory_space<vmem>>, vector<8x24xbf16>
    %cst_11 = arith.constant dense<0.000000e+00> : vector<128x24xf32>
    %14 = tpu.matmul %12, %13, %cst_11 {dimension_numbers = #tpu.dot_dimension_numbers<[1], [0], [0], [1], [0, 0, 1, 1], [], []>} : vector<128x8xbf16>, vector<8x24xbf16>, vector<128x24xf32> -> vector<128x24xf32>
    %c0_12 = arith.constant 0 : index
    %c0_13 = arith.constant 0 : index
    %15 = vector.load %arg6[%c0_12, %c0_13] : memref<1x24xf32, #tpu.memory_space<vmem>>, vector<1x24xf32>
    %16 = vector.broadcast %15 : vector<1x24xf32> to vector<128x24xf32>
    %17 = arith.addf %14, %16 : vector<128x24xf32>
    %18 = vector.extract_strided_slice %17 {offsets = [0, 0], sizes = [128, 8], strides = [1, 1]} : vector<128x24xf32> to vector<128x8xf32>
    %19 = vector.shape_cast %18 : vector<128x8xf32> to vector<8x16x8xf32>
    %20 = vector.extract_strided_slice %17 {offsets = [0, 8], sizes = [128, 8], strides = [1, 1]} : vector<128x24xf32> to vector<128x8xf32>
    %21 = vector.shape_cast %20 : vector<128x8xf32> to vector<8x16x8xf32>
    %22 = vector.extract_strided_slice %17 {offsets = [0, 16], sizes = [128, 8], strides = [1, 1]} : vector<128x24xf32> to vector<128x8xf32>
    %23 = vector.shape_cast %22 : vector<128x8xf32> to vector<8x16x8xf32>
    %24 = arith.truncf %19 : vector<8x16x8xf32> to vector<8x16x8xbf16>
    %25 = arith.truncf %21 : vector<8x16x8xf32> to vector<8x16x8xbf16>
    "tpu.trace_start"() <{level = 10 : i32, message = "gld,gmd->glm"}> : () -> ()
    %cst_14 = arith.constant dense<0.000000e+00> : vector<8x16x16xf32>
    %26 = tpu.matmul %24, %25, %cst_14 {dimension_numbers = #tpu.dot_dimension_numbers<[2], [2], [1], [1], [0, 0, 0, 1, 1, 1], [0], [0]>} : vector<8x16x8xbf16>, vector<8x16x8xbf16>, vector<8x16x16xf32> -> vector<8x16x16xf32>
    "tpu.trace_stop"() : () -> ()
    %cst_15 = arith.constant dense<0xFF800000> : vector<8x16xf32>
    %27 = vector.multi_reduction <maximumf>, %26, %cst_15 [2] : vector<8x16x16xf32> to vector<8x16xf32>
    %28 = vector.shape_cast %27 : vector<8x16xf32> to vector<8x16x1xf32>
    %29 = vector.broadcast %28 : vector<8x16x1xf32> to vector<8x16x16xf32>
    %30 = arith.subf %26, %29 : vector<8x16x16xf32>
    %31 = math.exp %30 : vector<8x16x16xf32>
    %cst_16 = arith.constant dense<0.000000e+00> : vector<8x16xf32>
    %32 = vector.multi_reduction <add>, %31, %cst_16 [2] : vector<8x16x16xf32> to vector<8x16xf32>
    %33 = vector.shape_cast %32 : vector<8x16xf32> to vector<8x16x1xf32>
    %34 = tpu.reciprocal %33 {approx = true} : vector<8x16x1xf32> -> vector<8x16x1xf32>
    %35 = vector.broadcast %34 : vector<8x16x1xf32> to vector<8x16x16xf32>
    %36 = arith.mulf %31, %35 : vector<8x16x16xf32>
    %37 = arith.truncf %36 : vector<8x16x16xf32> to vector<8x16x16xbf16>
    %38 = arith.truncf %23 : vector<8x16x8xf32> to vector<8x16x8xbf16>
    "tpu.trace_start"() <{level = 10 : i32, message = "glm,gmd->gld"}> : () -> ()
    %cst_17 = arith.constant dense<0.000000e+00> : vector<8x16x8xf32>
    %39 = tpu.matmul %37, %38, %cst_17 {dimension_numbers = #tpu.dot_dimension_numbers<[2], [1], [1], [2], [0, 0, 0, 1, 1, 2], [0], [0]>} : vector<8x16x16xbf16>, vector<8x16x8xbf16>, vector<8x16x8xf32> -> vector<8x16x8xf32>
    "tpu.trace_stop"() : () -> ()
    %c0_18 = arith.constant 0 : index
    %c0_19 = arith.constant 0 : index
    %40 = vector.load %arg7[%c0_18, %c0_19] : memref<1x1xf32, #tpu.memory_space<vmem>>, vector<1x1xf32>
    %41 = vector.extract %40[0, 0] : f32 from vector<1x1xf32>
    %42 = vector.broadcast %41 : f32 to vector<8x16x8xf32>
    %43 = arith.mulf %42, %39 : vector<8x16x8xf32>
    %44 = vector.shape_cast %11 : vector<128x8xf32> to vector<8x16x8xf32>
    %45 = arith.addf %43, %44 : vector<8x16x8xf32>
    %c0_20 = arith.constant 0 : index
    %c0_21 = arith.constant 0 : index
    %c0_22 = arith.constant 0 : index
    %46 = vector.load %arg8[%c0_20, %c0_21, %c0_22] : memref<8x16x8xf32, #tpu.memory_space<vmem>>, vector<8x16x8xf32>
    tpu.vector_store %arg8[%c0_20, %c0_21, %c0_22], %45 {strides = array<i32>} : memref<8x16x8xf32, #tpu.memory_space<vmem>>, vector<8x16x8xf32>,
    return
  }
  func.func @transform_0(%arg0: i32) -> (i32, i32, i32) {
    %c0_i32 = arith.constant 0 : i32
    %c0_i32_0 = arith.constant 0 : i32
    %c0_i32_1 = arith.constant 0 : i32
    return %arg0, %c0_i32, %c0_i32_0 : i32, i32, i32
  }
  func.func @transform_1(%arg0: i32) -> (i32, i32) {
    %c0_i32 = arith.constant 0 : i32
    %c0_i32_0 = arith.constant 0 : i32
    %c0_i32_1 = arith.constant 0 : i32
    return %c0_i32, %c0_i32_0 : i32, i32
  }
  func.func @transform_2(%arg0: i32) -> (i32, i32) {
    %c0_i32 = arith.constant 0 : i32
    %c0_i32_0 = arith.constant 0 : i32
    %c0_i32_1 = arith.constant 0 : i32
    return %c0_i32, %c0_i32_0 : i32, i32
  }
  func.func @transform_3(%arg0: i32) -> (i32, i32) {
    %c0_i32 = arith.constant 0 : i32
    %c0_i32_0 = arith.constant 0 : i32
    %c0_i32_1 = arith.constant 0 : i32
    return %c0_i32, %c0_i32_0 : i32, i32
  }
  func.func @transform_4(%arg0: i32) -> (i32, i32) {
    %c0_i32 = arith.constant 0 : i32
    %c0_i32_0 = arith.constant 0 : i32
    %c0_i32_1 = arith.constant 0 : i32
    return %c0_i32, %c0_i32_0 : i32, i32
  }
  func.func @transform_5(%arg0: i32) -> (i32, i32) {
    %c0_i32 = arith.constant 0 : i32
    %c0_i32_0 = arith.constant 0 : i32
    %c0_i32_1 = arith.constant 0 : i32
    return %c0_i32, %c0_i32_0 : i32, i32
  }
  func.func @transform_6(%arg0: i32) -> (i32, i32) {
    %c0_i32 = arith.constant 0 : i32
    %c0_i32_0 = arith.constant 0 : i32
    %c0_i32_1 = arith.constant 0 : i32
    return %c0_i32, %c0_i32_0 : i32, i32
  }
  func.func @transform_7(%arg0: i32) -> (i32, i32, i32) {
    %c0_i32 = arith.constant 0 : i32
    %c0_i32_0 = arith.constant 0 : i32
    %c0_i32_1 = arith.constant 0 : i32
    return %arg0, %c0_i32, %c0_i32_0 : i32, i32, i32
  }
}

module attributes {stable_mosaic.version = 11 : i64} {
  func.func @_row_block_kernel(%arg0: i32, %arg1: memref<8x16x8xf32, #tpu.memory_space<vmem>>, %arg2: memref<8x16x16xf32, #tpu.memory_space<vmem>>, %arg3: memref<8x24xbf16, #tpu.memory_space<vmem>>, %arg4: memref<1x24xf32, #tpu.memory_space<vmem>>, %arg5: memref<1x1xf32, #tpu.memory_space<vmem>>, %arg6: memref<8x16xbf16, #tpu.memory_space<vmem>>, %arg7: memref<1x16xf32, #tpu.memory_space<vmem>>, %arg8: memref<1x16xf32, #tpu.memory_space<vmem>>, %arg9: memref<8x16x16xf32, #tpu.memory_space<vmem>>) attributes {dimension_semantics = [#tpu.dimension_semantics<parallel>], iteration_bounds = array<i64: 4>, scalar_prefetch = 0 : i64, scratch_operands = 0 : i64, tpu.core_type = #tpu.core_type<tc>, window_params = [{transform_indices = @transform_0, window_bounds = array<i64: 8, 16, 8>}, {transform_indices = @transform_1, window_bounds = array<i64: 8, 16, 16>}, {pipeline_mode = #tpu.pipeline_mode<synchronous>, transform_indices = @transform_2, window_bounds = array<i64: 8, 24>}, {pipeline_mode = #tpu.pipeline_mode<synchronous>, transform_indices = @transform_3, window_bounds = array<i64: 1, 24>}, {pipeline_mode = #tpu.pipeline_mode<synchronous>, transform_indices = @transform_4, window_bounds = array<i64: 1, 1>}, {pipeline_mode = #tpu.pipeline_mode<synchronous>, transform_indices = @transform_5, window_bounds = array<i64: 8, 16>}, {pipeline_mode = #tpu.pipeline_mode<synchronous>, transform_indices = @transform_6, window_bounds = array<i64: 1, 16>}, {pipeline_mode = #tpu.pipeline_mode<synchronous>, transform_indices = @transform_7, window_bounds = array<i64: 1, 16>}, {transform_indices = @transform_8, window_bounds = array<i64: 8, 16, 16>}]} {
    %c0 = arith.constant 0 : index
    %c0_0 = arith.constant 0 : index
    %c0_1 = arith.constant 0 : index
    %0 = vector.load %arg1[%c0, %c0_0, %c0_1] : memref<8x16x8xf32, #tpu.memory_space<vmem>>, vector<8x16x8xf32>
    %1 = vector.shape_cast %0 : vector<8x16x8xf32> to vector<128x8xf32>
    %2 = arith.truncf %1 : vector<128x8xf32> to vector<128x8xbf16>
    %c0_2 = arith.constant 0 : index
    %c0_3 = arith.constant 0 : index
    %3 = vector.load %arg3[%c0_2, %c0_3] : memref<8x24xbf16, #tpu.memory_space<vmem>>, vector<8x24xbf16>
    %cst = arith.constant dense<0.000000e+00> : vector<128x24xf32>
    %4 = tpu.matmul %2, %3, %cst {dimension_numbers = #tpu.dot_dimension_numbers<[1], [0], [0], [1], [0, 0, 1, 1], [], []>} : vector<128x8xbf16>, vector<8x24xbf16>, vector<128x24xf32> -> vector<128x24xf32>
    %c0_4 = arith.constant 0 : index
    %c0_5 = arith.constant 0 : index
    %5 = vector.load %arg4[%c0_4, %c0_5] : memref<1x24xf32, #tpu.memory_space<vmem>>, vector<1x24xf32>
    %6 = vector.broadcast %5 : vector<1x24xf32> to vector<128x24xf32>
    %7 = arith.addf %4, %6 : vector<128x24xf32>
    %8 = vector.extract_strided_slice %7 {offsets = [0, 0], sizes = [128, 8], strides = [1, 1]} : vector<128x24xf32> to vector<128x8xf32>
    %9 = vector.shape_cast %8 : vector<128x8xf32> to vector<8x16x8xf32>
    %10 = vector.extract_strided_slice %7 {offsets = [0, 8], sizes = [128, 8], strides = [1, 1]} : vector<128x24xf32> to vector<128x8xf32>
    %11 = vector.shape_cast %10 : vector<128x8xf32> to vector<8x16x8xf32>
    %12 = vector.extract_strided_slice %7 {offsets = [0, 16], sizes = [128, 8], strides = [1, 1]} : vector<128x24xf32> to vector<128x8xf32>
    %13 = vector.shape_cast %12 : vector<128x8xf32> to vector<8x16x8xf32>
    %14 = arith.truncf %9 : vector<8x16x8xf32> to vector<8x16x8xbf16>
    %15 = arith.truncf %11 : vector<8x16x8xf32> to vector<8x16x8xbf16>
    "tpu.trace_start"() <{level = 10 : i32, message = "gld,gmd->glm"}> : () -> ()
    %cst_6 = arith.constant dense<0.000000e+00> : vector<8x16x16xf32>
    %16 = tpu.matmul %14, %15, %cst_6 {dimension_numbers = #tpu.dot_dimension_numbers<[2], [2], [1], [1], [0, 0, 0, 1, 1, 1], [0], [0]>} : vector<8x16x8xbf16>, vector<8x16x8xbf16>, vector<8x16x16xf32> -> vector<8x16x16xf32>
    "tpu.trace_stop"() : () -> ()
    %cst_7 = arith.constant dense<0xFF800000> : vector<8x16xf32>
    %17 = vector.multi_reduction <maximumf>, %16, %cst_7 [2] : vector<8x16x16xf32> to vector<8x16xf32>
    %18 = vector.shape_cast %17 : vector<8x16xf32> to vector<8x16x1xf32>
    %19 = vector.broadcast %18 : vector<8x16x1xf32> to vector<8x16x16xf32>
    %20 = arith.subf %16, %19 : vector<8x16x16xf32>
    %21 = math.exp %20 : vector<8x16x16xf32>
    %cst_8 = arith.constant dense<0.000000e+00> : vector<8x16xf32>
    %22 = vector.multi_reduction <add>, %21, %cst_8 [2] : vector<8x16x16xf32> to vector<8x16xf32>
    %23 = vector.shape_cast %22 : vector<8x16xf32> to vector<8x16x1xf32>
    %24 = tpu.reciprocal %23 {approx = true} : vector<8x16x1xf32> -> vector<8x16x1xf32>
    %25 = vector.broadcast %24 : vector<8x16x1xf32> to vector<8x16x16xf32>
    %26 = arith.mulf %21, %25 : vector<8x16x16xf32>
    %27 = arith.truncf %26 : vector<8x16x16xf32> to vector<8x16x16xbf16>
    %28 = arith.truncf %13 : vector<8x16x8xf32> to vector<8x16x8xbf16>
    "tpu.trace_start"() <{level = 10 : i32, message = "glm,gmd->gld"}> : () -> ()
    %cst_9 = arith.constant dense<0.000000e+00> : vector<8x16x8xf32>
    %29 = tpu.matmul %27, %28, %cst_9 {dimension_numbers = #tpu.dot_dimension_numbers<[2], [1], [1], [2], [0, 0, 0, 1, 1, 2], [0], [0]>} : vector<8x16x16xbf16>, vector<8x16x8xbf16>, vector<8x16x8xf32> -> vector<8x16x8xf32>
    "tpu.trace_stop"() : () -> ()
    %30 = vector.shape_cast %29 : vector<8x16x8xf32> to vector<128x8xf32>
    %c0_10 = arith.constant 0 : index
    %c0_11 = arith.constant 0 : index
    %31 = vector.load %arg5[%c0_10, %c0_11] : memref<1x1xf32, #tpu.memory_space<vmem>>, vector<1x1xf32>
    %32 = vector.extract %31[0, 0] : f32 from vector<1x1xf32>
    %33 = vector.broadcast %32 : f32 to vector<128x8xf32>
    %34 = arith.mulf %33, %30 : vector<128x8xf32>
    %35 = arith.addf %34, %1 : vector<128x8xf32>
    %cst_12 = arith.constant 0.000000e+00 : f32
    %36 = vector.broadcast %cst_12 : f32 to vector<128x8xf32>
    %37 = arith.maximumf %35, %36 : vector<128x8xf32>
    %38 = arith.truncf %37 : vector<128x8xf32> to vector<128x8xbf16>
    %c0_13 = arith.constant 0 : index
    %c0_14 = arith.constant 0 : index
    %39 = vector.load %arg6[%c0_13, %c0_14] : memref<8x16xbf16, #tpu.memory_space<vmem>>, vector<8x16xbf16>
    %cst_15 = arith.constant dense<0.000000e+00> : vector<128x16xf32>
    %40 = tpu.matmul %38, %39, %cst_15 {dimension_numbers = #tpu.dot_dimension_numbers<[1], [0], [0], [1], [0, 0, 1, 1], [], []>} : vector<128x8xbf16>, vector<8x16xbf16>, vector<128x16xf32> -> vector<128x16xf32>
    %c0_16 = arith.constant 0 : index
    %c0_17 = arith.constant 0 : index
    %41 = vector.load %arg7[%c0_16, %c0_17] : memref<1x16xf32, #tpu.memory_space<vmem>>, vector<1x16xf32>
    %42 = vector.broadcast %41 : vector<1x16xf32> to vector<128x16xf32>
    %43 = arith.mulf %40, %42 : vector<128x16xf32>
    %c0_18 = arith.constant 0 : index
    %c0_19 = arith.constant 0 : index
    %44 = vector.load %arg8[%c0_18, %c0_19] : memref<1x16xf32, #tpu.memory_space<vmem>>, vector<1x16xf32>
    %45 = vector.broadcast %44 : vector<1x16xf32> to vector<128x16xf32>
    %46 = arith.addf %43, %45 : vector<128x16xf32>
    %c0_20 = arith.constant 0 : index
    %c0_21 = arith.constant 0 : index
    %c0_22 = arith.constant 0 : index
    %47 = vector.load %arg2[%c0_20, %c0_21, %c0_22] : memref<8x16x16xf32, #tpu.memory_space<vmem>>, vector<8x16x16xf32>
    %48 = vector.shape_cast %47 : vector<8x16x16xf32> to vector<128x16xf32>
    %49 = arith.addf %46, %48 : vector<128x16xf32>
    %cst_23 = arith.constant 0.000000e+00 : f32
    %50 = vector.broadcast %cst_23 : f32 to vector<128x16xf32>
    %51 = arith.maximumf %49, %50 : vector<128x16xf32>
    %52 = vector.shape_cast %51 : vector<128x16xf32> to vector<8x16x16xf32>
    %c0_24 = arith.constant 0 : index
    %c0_25 = arith.constant 0 : index
    %c0_26 = arith.constant 0 : index
    %53 = vector.load %arg9[%c0_24, %c0_25, %c0_26] : memref<8x16x16xf32, #tpu.memory_space<vmem>>, vector<8x16x16xf32>
    tpu.vector_store %arg9[%c0_24, %c0_25, %c0_26], %52 {strides = array<i32>} : memref<8x16x16xf32, #tpu.memory_space<vmem>>, vector<8x16x16xf32>,
    return
  }
  func.func @transform_0(%arg0: i32) -> (i32, i32, i32) {
    %c0_i32 = arith.constant 0 : i32
    %c0_i32_0 = arith.constant 0 : i32
    %c0_i32_1 = arith.constant 0 : i32
    return %arg0, %c0_i32, %c0_i32_0 : i32, i32, i32
  }
  func.func @transform_1(%arg0: i32) -> (i32, i32, i32) {
    %c0_i32 = arith.constant 0 : i32
    %c0_i32_0 = arith.constant 0 : i32
    %c0_i32_1 = arith.constant 0 : i32
    return %arg0, %c0_i32, %c0_i32_0 : i32, i32, i32
  }
  func.func @transform_2(%arg0: i32) -> (i32, i32) {
    %c0_i32 = arith.constant 0 : i32
    %c0_i32_0 = arith.constant 0 : i32
    %c0_i32_1 = arith.constant 0 : i32
    return %c0_i32, %c0_i32_0 : i32, i32
  }
  func.func @transform_3(%arg0: i32) -> (i32, i32) {
    %c0_i32 = arith.constant 0 : i32
    %c0_i32_0 = arith.constant 0 : i32
    %c0_i32_1 = arith.constant 0 : i32
    return %c0_i32, %c0_i32_0 : i32, i32
  }
  func.func @transform_4(%arg0: i32) -> (i32, i32) {
    %c0_i32 = arith.constant 0 : i32
    %c0_i32_0 = arith.constant 0 : i32
    %c0_i32_1 = arith.constant 0 : i32
    return %c0_i32, %c0_i32_0 : i32, i32
  }
  func.func @transform_5(%arg0: i32) -> (i32, i32) {
    %c0_i32 = arith.constant 0 : i32
    %c0_i32_0 = arith.constant 0 : i32
    %c0_i32_1 = arith.constant 0 : i32
    return %c0_i32, %c0_i32_0 : i32, i32
  }
  func.func @transform_6(%arg0: i32) -> (i32, i32) {
    %c0_i32 = arith.constant 0 : i32
    %c0_i32_0 = arith.constant 0 : i32
    %c0_i32_1 = arith.constant 0 : i32
    return %c0_i32, %c0_i32_0 : i32, i32
  }
  func.func @transform_7(%arg0: i32) -> (i32, i32) {
    %c0_i32 = arith.constant 0 : i32
    %c0_i32_0 = arith.constant 0 : i32
    %c0_i32_1 = arith.constant 0 : i32
    return %c0_i32, %c0_i32_0 : i32, i32
  }
  func.func @transform_8(%arg0: i32) -> (i32, i32, i32) {
    %c0_i32 = arith.constant 0 : i32
    %c0_i32_0 = arith.constant 0 : i32
    %c0_i32_1 = arith.constant 0 : i32
    return %arg0, %c0_i32, %c0_i32_0 : i32, i32, i32
  }
}

</mosaic_0001>

<bundles_post_ra>
// kernel: axial_block_dynamic.2
= control target key start
LH: loop header
LB: loop body
LE: loop exit
PB: predicated region body
PF: predicated region fallthrough
CT: control target
= control target key end

     0   :  { %s2141_s26 = smov 0   ;;  %s2679_s0 = inlined_call_operand.vmem [shape: bf16[32,16,16], index: 0, kind: input, shape index: {}]   ;;  %s2680_s1 = inlined_call_operand.vmem [shape: bf16[16,8], index: 1, kind: input, shape index: {}]   ;;  %s2681_s2 = inlined_call_operand.vmem [shape: f32[1,8], index: 2, kind: input, shape index: {}]   ;;  %s2682_s3 = inlined_call_operand.vmem [shape: f32[1,8], index: 3, kind: input, shape index: {}]   ;;  %s2683_s4 = inlined_call_operand.vmem [shape: bf16[8,24], index: 4, kind: input, shape index: {}]   ;;  %s2684_s5 = inlined_call_operand.vmem [shape: f32[1,24], index: 5, kind: input, shape index: {}]   ;;  %s2685_s6 = inlined_call_operand.<no memory space> [shape: f32[1,1], index: 6, kind: input, shape index: {}]   ;;  %s2686_s7 = inlined_call_operand.vmem [shape: f32[32,16,8], index: 7, kind: output, shape index: {}]  }
   0x1   :  { %v12_v0 = vstv %s2685_s6 }
   0x2   :  { %13 = vst [vmem:[#allocation2] sm:$0x1] %v12_v0 }
   0x3 LB: > { %s1757_s27 = sadd.s32 4294967295, %s2092_s26   ;;  %p1761_p0 = scmp.ge.s32.totalorder %s2092_s26, 1  ;;  %s2092_s26 = sphi %s2141_s26, %s19_s26  }
   0x4   : > { %p241_p1 = scmp.lt.s32.totalorder %s2092_s26, 5 }
   0x6   : > { %p242_p2 = pnand %p1761_p0, %p241_p1 }
   0x7   : > { %v2013_v1 = vld [vmem:[%s2680_s1] sm:$0xff] (!%p242_p2)   ;;  %s1762_s6 = sshll.u32 (!%p242_p2), %s1757_s27, 3  ;;  %vm354_vm0 = vcmask (!%p242_p2), 130048   ;;  %vm579_vm1 = vcmask (!%p242_p2), 1043456   ;;  %vm554_vm2 = vcmask (!%p242_p2), 64512   ;;  %vm2095_vm3 = vmmov (!%p242_p2), 0  }
   0x8   : > { %245 = sbr.rel (%p242_p2) target bundleno = 1374 (0x55e), region = 48  ;;  %p276_p3 = scmp.lt.s32.totalorder (!%p242_p2), %s1762_s6, 31  ;;  %1866 = vmatprep.subr.bf16.mxu0 (!%p242_p2), %v2013_v1  ;;  %v546_v10 = vld [vmem:[%s2683_s4] sm:$0xf] (!%p242_p2) }
   0x9   : > { %1867 = vmatpush3.bf16.msra.mxu0 (!%p242_p2), %v2013_v1  ;;  %1998 = vmatprep.subr.msk.bf16.mxu1 (!%p242_p2), %vm579_vm1, %v546_v10  ;;  %v581_v11 = vsel (!%p242_p2), %vm579_vm1, %v546_v10, 0  ;;  %v2172_v12 = vld [vmem:[%s2681_s2] ss:$0 sm:$0xff] (!%p242_p2)  ;;  %s2096_s19 = smov (!%p242_p2), 120   ;;  %s2097_s20 = smov (!%p242_p2), 112  }
   0xa   : > { %1885 = vmatpush3.bf16.msra.mxu1 (!%p242_p2), %v581_v11  ;;  %v2178_v15 = vld [vmem:[%s2682_s3] ss:$0 sm:$0xff] (!%p242_p2) }
   0xf   : > { %s2696_s6 = smov (!%p276_p3, %s1762_s6), 31 }
  0x10   : > { %s1814_s30 = sshll.u32 %s2696_s6, 3  ;;  %s1815_s22 = sshll.u32 %s2696_s6, 4 }
  0x11   : > { %s280_s10 = scalar_lea.vmem %s2679_s0, %s1814_s30  ;;  %s2595_s25 = scalar_lea.vmem %s2686_s7, %s1815_s22 }
  0x12   : > { %v2014_v2 = vld [vmem:[%s280_s10] sm:$0xff]   ;;  %v2015_v3 = vld [vmem:[%s280_s10 + $0x8] sm:$0xff]   ;;  %v2016_v4 = vld [vmem:[%s280_s10 + $0x10] sm:$0xff]  }
  0x13   : > { %1868 = vmatprep.mubr.msk.bf16.mxu0 %vm354_vm0, %v2014_v2  ;;  %v2017_v5 = vld [vmem:[%s280_s10 + $0x18] sm:$0xff]   ;;  %v2018_v6 = vld [vmem:[%s280_s10 + $0x20] sm:$0xff]   ;;  %v2019_v7 = vld [vmem:[%s280_s10 + $0x28] sm:$0xff]  }
  0x14   : > { %1869 = vmatmul.mubr.msk.bf16.vlgmr.msra.gmra.mrb[0].mxu0 %vm354_vm0, %v2015_v3  ;;  %v2020_v8 = vld [vmem:[%s280_s10 + $0x30] sm:$0xff]   ;;  %v2021_v9 = vld [vmem:[%s280_s10 + $0x38] sm:$0xff]  }
  0x15   : > { %1872 = vmatprep.mubr.msk.bf16.mxu0 %vm354_vm0, %v2016_v4 }
  0x1c   : > { %1873 = vmatmul.mubr.msk.bf16.gmra.mrb[4].mxu0 %vm354_vm0, %v2017_v5 }
  0x1d   : > { %1876 = vmatprep.mubr.msk.bf16.mxu0 %vm354_vm0, %v2018_v6 }
  0x24   : > { %1877 = vmatmul.mubr.msk.bf16.gmra.mrb[8].mxu0 %vm354_vm0, %v2019_v7 }
  0x25   : > { %1880 = vmatprep.mubr.msk.bf16.mxu0 %vm354_vm0, %v2020_v8 }
  0x2c   : > { %1881 = vmatmul.mubr.msk.bf16.gmra.mrb[12].mxu0 %vm354_vm0, %v2021_v9 }
  0xe7   : > { %v1870_v13 = vpop.f32.mrb[0].mxu0 }
  0xe8   : > { %v485_v14 = vmul.f32 %v1870_v13, %v2172_v12  ;;  %v413_v16 = vpop.f32.mrb[1].mxu0 }
  0xe9   : > { %v483_v17 = vmul.f32 %v2172_v12, %v413_v16  ;;  %v1871_v18 = vpop.f32.mrb[2].mxu0 }
  0xea   : > { %v486_v19 = vmul.f32 %v1871_v18, %v2172_v12  ;;  %v416_v20 = vpop.f32.mrb[3].mxu0  ;;  %v2187_v23 = vadd.f32 %v2178_v15, %v485_v14 }
  0xeb   : > { %v2183_v21 = vadd.f32 %v2178_v15, %v483_v17  ;;  %v484_v22 = vmul.f32 %v2172_v12, %v416_v20 }
  0xec   : > { %v2190_v24 = vadd.f32 %v2178_v15, %v486_v19  ;;  %v524_v30 = vmax.f32 %v2187_v23, 0.0 }
  0xed   : > { %v2193_v25 = vadd.f32 %v2178_v15, %v484_v22  ;;  %v522_v27 = vmax.f32 %v2183_v21, 0.0 }
  0xee   : > { %v525_v26 = vmax.f32 %v2190_v24, 0.0 }
  0xef   : > { %v523_v28 = vmax.f32 %v2193_v25, 0.0  ;;  %v1874_v29 = vpop.f32.mrb[4].mxu0 }
  0xf0   : > { %v489_v31 = vmul.f32 %v1874_v29, %v2172_v12  ;;  %v429_v32 = vpop.f32.mrb[5].mxu0  ;;  %v539_v36 = vpack.c.bf16 %v525_v26, %v524_v30 }
  0xf1   : > { %v487_v33 = vmul.f32 %v2172_v12, %v429_v32  ;;  %v1875_v34 = vpop.f32.mrb[6].mxu0  ;;  %v538_v35 = vpack.c.bf16 %v523_v28, %v522_v27  ;;  %v1787_v32 = vld [vmem:[%s2684_s5] ss:$0 sm:$0xff] }
  0xf2   : > { %v2210_v37 = vadd.f32 %v2178_v15, %v489_v31  ;;  %v490_v38 = vmul.f32 %v1875_v34, %v2172_v12  ;;  %v432_v39 = vpop.f32.mrb[7].mxu0 }
  0xf3   : > { %v2214_v40 = vadd.f32 %v2178_v15, %v487_v33  ;;  %v488_v41 = vmul.f32 %v2172_v12, %v432_v39  ;;  %1886 = vmatprep.mubr.msk.bf16.mxu1 %vm554_vm2, %v538_v35 }
  0xf4   : > { %v528_v42 = vmax.f32 %v2210_v37, 0.0  ;;  %v2220_v43 = vadd.f32 %v2178_v15, %v490_v38  ;;  %1887 = vmatmul.mubr.msk.bf16.vlgmr.msra.gmra.mrb[0].mxu1 %vm554_vm2, %v539_v36 }
  0xf5   : > { %v526_v44 = vmax.f32 %v2214_v40, 0.0  ;;  %v2225_v45 = vadd.f32 %v2178_v15, %v488_v41 }
  0xf6   : > { %v529_v46 = vmax.f32 %v2220_v43, 0.0 }
  0xf7   : > { %v527_v47 = vmax.f32 %v2225_v45, 0.0  ;;  %v1878_v48 = vpop.f32.mrb[8].mxu0 }
  0xf8   : > { %v541_v49 = vpack.c.bf16 %v529_v46, %v528_v42  ;;  %v493_v50 = vmul.f32 %v1878_v48, %v2172_v12  ;;  %v445_v51 = vpop.f32.mrb[9].mxu0 }
  0xf9   : > { %v540_v52 = vpack.c.bf16 %v527_v47, %v526_v44  ;;  %v491_v53 = vmul.f32 %v2172_v12, %v445_v51  ;;  %v1879_v54 = vpop.f32.mrb[10].mxu0 }
  0xfa   : > { %v2240_v55 = vadd.f32 %v2178_v15, %v493_v50  ;;  %v494_v56 = vmul.f32 %v1879_v54, %v2172_v12  ;;  %v448_v57 = vpop.f32.mrb[11].mxu0 }
  0xfb   : > { %v2244_v58 = vadd.f32 %v2178_v15, %v491_v53  ;;  %v492_v59 = vmul.f32 %v2172_v12, %v448_v57  ;;  %1890 = vmatprep.mubr.msk.bf16.mxu1 %vm554_vm2, %v540_v52 }
  0xfc   : > { %v532_v60 = vmax.f32 %v2240_v55, 0.0  ;;  %v2250_v61 = vadd.f32 %v2178_v15, %v494_v56  ;;  %1891 = vmatmul.mubr.msk.bf16.gmra.mrb[4].mxu1 %vm554_vm2, %v541_v49 }
  0xfd   : > { %v530_v62 = vmax.f32 %v2244_v58, 0.0  ;;  %v2255_v63 = vadd.f32 %v2178_v15, %v492_v59 }
  0xfe   : > { %v533_v0 = vmax.f32 %v2250_v61, 0.0 }
  0xff   : > { %v531_v1 = vmax.f32 %v2255_v63, 0.0  ;;  %v1882_v2 = vpop.f32.mrb[12].mxu0 }
 0x100   : > { %v543_v3 = vpack.c.bf16 %v533_v0, %v532_v60  ;;  %v497_v4 = vmul.f32 %v1882_v2, %v2172_v12  ;;  %v461_v5 = vpop.f32.mrb[13].mxu0 }
 0x101   : > { %v542_v6 = vpack.c.bf16 %v531_v1, %v530_v62  ;;  %v495_v7 = vmul.f32 %v2172_v12, %v461_v5  ;;  %v1883_v8 = vpop.f32.mrb[14].mxu0 }
 0x102   : > { %v2270_v9 = vadd.f32 %v2178_v15, %v497_v4  ;;  %v498_v10 = vmul.f32 %v1883_v8, %v2172_v12  ;;  %v464_v11 = vpop.f32.mrb[15].mxu0 }
 0x103   : > { %v2274_v13 = vadd.f32 %v2178_v15, %v495_v7  ;;  %v496_v14 = vmul.f32 %v2172_v12, %v464_v11  ;;  %1894 = vmatprep.mubr.msk.bf16.mxu1 %vm554_vm2, %v542_v6 }
 0x104   : > { %v2690_v16 = vmax.f32 %v2270_v9, 0.0  ;;  %v2280_v17 = vadd.f32 %v2178_v15, %v498_v10  ;;  %1895 = vmatmul.mubr.msk.bf16.gmra.mrb[8].mxu1 %vm554_vm2, %v543_v3  ;;  %v2691_v58 = vmax.f32 %v2270_v9, 0.0 }
 0x105   : > { %v2688_v18 = vmax.f32 %v2274_v13, 0.0  ;;  %v2285_v19 = vadd.f32 %v2178_v15, %v496_v14  ;;  %v2094_v15 = vmov 0.0  }
 0x106   : > { %v2689_v20 = vmax.f32 %v2280_v17, 0.0  ;;  %1902 = vmatprep.subr.bf16.mxu0 %v2094_v15  ;;  %1908 = vmatprep.subr.bf16.mxu1 %v2094_v15  ;;  %v2692_v63 = vmax.f32 %v2280_v17, 0.0 }
 0x107   : > { %v2687_v22 = vmax.f32 %v2285_v19, 0.0  ;;  %1904 = vmatprep.mubr.msk.bf16.mxu0 %vm2095_vm3, %v2094_v15 }
 0x108   : > { %v545_v12 = vpack.c.bf16 %v2689_v20, %v2690_v16 }
 0x109   : > { %v544_v29 = vpack.c.bf16 %v2687_v22, %v2688_v18 }
 0x10b   : > { %1898 = vmatprep.mubr.msk.bf16.mxu1 %vm554_vm2, %v544_v29 }
 0x10c   : > { %1899 = vmatmul.mubr.msk.bf16.gmra.mrb[12].mxu1 %vm554_vm2, %v545_v12 }
 0x10d   : > { %1910 = vmatprep.mubr.msk.bf16.mxu1 %vm2095_vm3, %v2094_v15 }
 0x1c7   : > { %v1888_v31 = vpop.f32.mrb[0].mxu1 }
 0x1c8   : > { %v617_v33 = vpop.f32.mrb[1].mxu1  ;;  %v626_v35 = vadd.f32 %v1888_v31, %v1787_v32 }
 0x1c9   : > { %v1889_v34 = vpop.f32.mrb[2].mxu1  ;;  %v618_v39 = vadd.f32 %v1787_v32, %v617_v33 }
 0x1ca   : > { %v629_v36 = vadd.f32 %v1889_v34, %v1787_v32  ;;  %v620_v38 = vpop.f32.mrb[3].mxu1 }
 0x1cb   : > { %v621_v41 = vadd.f32 %v1787_v32, %v620_v38 }
 0x1cc   : > { %v2308_v48 = vpack.c.bf16 %v629_v36, %v626_v35 }
 0x1cd   : > { %v680_v49 = vpack.c.bf16 %v621_v41, %v618_v39 }
 0x1cf   : > { %689 = vrot.lane.b32.xlu0 %v680_v49, %s2096_s19  ;;  %v1892_v50 = vpop.f32.mrb[4].mxu1 }
 0x1d0   : > { %v642_v51 = vadd.f32 %v1892_v50, %v1787_v32  ;;  %v633_v52 = vpop.f32.mrb[5].mxu1 }
 0x1d1   : > { %v634_v53 = vadd.f32 %v1787_v32, %v633_v52  ;;  %v1893_v54 = vpop.f32.mrb[6].mxu1 }
 0x1d2   : > { %v645_v56 = vadd.f32 %v1893_v54, %v1787_v32  ;;  %v636_v57 = vpop.f32.mrb[7].mxu1 }
 0x1d3   : > { %v637_v59 = vadd.f32 %v1787_v32, %v636_v57  ;;  %739 = vrot.lane.b32.xlu0 %v2308_v48, %s2096_s19 }
 0x1d4   : > { %v2313_v2 = vpack.c.bf16 %v645_v56, %v642_v51 }
 0x1d5   : > { %v2315_v3 = vpack.c.bf16 %v637_v59, %v634_v53 }
 0x1d7   : > { %789 = vrot.lane.b32.xlu1 %v2315_v3, %s2096_s19  ;;  %v1896_v4 = vpop.f32.mrb[8].mxu1 }
 0x1d8   : > { %v658_v5 = vadd.f32 %v1896_v4, %v1787_v32  ;;  %v649_v6 = vpop.f32.mrb[9].mxu1 }
 0x1d9   : > { %v650_v7 = vadd.f32 %v1787_v32, %v649_v6  ;;  %v1897_v8 = vpop.f32.mrb[10].mxu1 }
 0x1da   : > { %v661_v10 = vadd.f32 %v1897_v8, %v1787_v32  ;;  %v652_v11 = vpop.f32.mrb[11].mxu1 }
 0x1db   : > { %v653_v14 = vadd.f32 %v1787_v32, %v652_v11  ;;  %839 = vrot.lane.b32.xlu1 %v2313_v2, %s2096_s19 }
 0x1dc   : > { %v2321_v12 = vpack.c.bf16 %v661_v10, %v658_v5 }
 0x1dd   : > { %v2323_v29 = vpack.c.bf16 %v653_v14, %v650_v7 }
 0x1df   : > { %889 = vrot.lane.b32.xlu0 %v2323_v29, %s2096_s19  ;;  %v1900_v31 = vpop.f32.mrb[12].mxu1  ;;  %939 = vrot.lane.b32.xlu1 %v2321_v12, %s2096_s19 }
 0x1e0   : > { %v674_v33 = vadd.f32 %v1900_v31, %v1787_v32  ;;  %v665_v34 = vpop.f32.mrb[13].mxu1 }
 0x1e1   : > { %v666_v35 = vadd.f32 %v1787_v32, %v665_v34  ;;  %v1901_v36 = vpop.f32.mrb[14].mxu1 }
 0x1e2   : > { %v677_v38 = vadd.f32 %v1901_v36, %v1787_v32  ;;  %v668_v39 = vpop.f32.mrb[15].mxu1 }
 0x1e3   : > { %v669_v41 = vadd.f32 %v1787_v32, %v668_v39 }
 0x1e4   : > { %v2329_v50 = vpack.c.bf16 %v677_v38, %v674_v33 }
 0x1e5   : > { %v2331_v51 = vpack.c.bf16 %v669_v41, %v666_v35 }
 0x1e6   : > { %1039 = vrot.lane.b32.xlu1 %v2329_v50, %s2096_s19 }
 0x1e7   : > { %989 = vrot.lane.b32.xlu0 %v2331_v51, %s2096_s19 }
 0x1ea   : > { %1272 = vrot.lane.b32.xlu1 %v680_v49, %s2097_s20 }
 0x241   : > { %v690_v52 = vpop.permute.xlu0 %689 }
 0x242   : > { %v695_v53 = vsel %vm554_vm2, %v690_v52, 0 }
 0x243   : > { %1903 = vmatpush3.bf16.xpose.msra.mxu0 %v695_v53 }
 0x244   : > { %1914 = vmatprep.subr.bf16.mxu0 %v2094_v15 }
 0x245   : > { %v740_v32 = vpop.permute.xlu0 %739 }
 0x246   : > { %v745_v54 = vsel %vm554_vm2, %v740_v32, 0 }
 0x247   : > { %1909 = vmatpush3.bf16.xpose.msra.mxu1 %v745_v54 }
 0x248   : > { %1920 = vmatprep.subr.bf16.mxu1 %v2094_v15 }
 0x249   : > { %v790_v56 = vpop.permute.xlu1 %789 }
 0x24a   : > { %v795_v57 = vsel %vm554_vm2, %v790_v56, 0  ;;  %1905 = vmatmul.mubr.msk.bf16.vlgmr.msra.gmra.mrb[16].mxu0 %vm554_vm2, %v680_v49 }
 0x24b   : > { %1915 = vmatpush3.bf16.xpose.msra.mxu0 %v795_v57  ;;  %1916 = vmatprep.mubr.msk.bf16.mxu0 %vm2095_vm3, %v2094_v15 }
 0x24c   : > { %1926 = vmatprep.subr.bf16.mxu0 %v2094_v15 }
 0x24d   : > { %v840_v59 = vpop.permute.xlu1 %839 }
 0x24e   : > { %v845_v4 = vsel %vm554_vm2, %v840_v59, 0  ;;  %1911 = vmatmul.mubr.msk.bf16.vlgmr.msra.gmra.mrb[16].mxu1 %vm554_vm2, %v2308_v48 }
 0x24f   : > { %1921 = vmatpush3.bf16.xpose.msra.mxu1 %v845_v4  ;;  %1922 = vmatprep.mubr.msk.bf16.mxu1 %vm2095_vm3, %v2094_v15 }
 0x250   : > { %1932 = vmatprep.subr.bf16.mxu1 %v2094_v15 }
 0x251   : > { %v890_v5 = vpop.permute.xlu0 %889  ;;  %v940_v49 = vpop.permute.xlu1 %939 }
 0x252   : > { %v895_v6 = vsel %vm554_vm2, %v890_v5, 0  ;;  %1917 = vmatmul.mubr.msk.bf16.vlgmr.msra.gmra.mrb[20].mxu0 %vm554_vm2, %v2315_v3  ;;  %v945_v7 = vsel %vm554_vm2, %v940_v49, 0 }
 0x253   : > { %1927 = vmatpush3.bf16.xpose.msra.mxu0 %v895_v6  ;;  %1928 = vmatprep.mubr.msk.bf16.mxu0 %vm2095_vm3, %v2094_v15 }
 0x254   : > { %1938 = vmatprep.subr.bf16.mxu0 %v2094_v15 }
 0x256   : > { %1923 = vmatmul.mubr.msk.bf16.vlgmr.msra.gmra.mrb[20].mxu1 %vm554_vm2, %v2313_v2 }
 0x257   : > { %1933 = vmatpush3.bf16.xpose.msra.mxu1 %v945_v7  ;;  %1934 = vmatprep.mubr.msk.bf16.mxu1 %vm2095_vm3, %v2094_v15 }
 0x258   : > { %1944 = vmatprep.subr.bf16.mxu1 %v2094_v15  ;;  %v1040_v11 = vpop.permute.xlu1 %1039 }
 0x259   : > { %v990_v8 = vpop.permute.xlu0 %989  ;;  %v1045_v14 = vsel %vm554_vm2, %v1040_v11, 0 }
 0x25a   : > { %v995_v10 = vsel %vm554_vm2, %v990_v8, 0  ;;  %1929 = vmatmul.mubr.msk.bf16.vlgmr.msra.gmra.mrb[24].mxu0 %vm554_vm2, %v2323_v29 }
 0x25b   : > { %1939 = vmatpush3.bf16.xpose.msra.mxu0 %v995_v10  ;;  %1940 = vmatprep.mubr.msk.bf16.mxu0 %vm2095_vm3, %v2094_v15 }
 0x25c   : > { %1950 = vmatprep.subr.bf16.mxu0 %v2094_v15  ;;  %v1273_v31 = vpop.permute.xlu1 %1272 }
 0x25e   : > { %1935 = vmatmul.mubr.msk.bf16.vlgmr.msra.gmra.mrb[24].mxu1 %vm554_vm2, %v2321_v12 }
 0x25f   : > { %1945 = vmatpush3.bf16.xpose.msra.mxu1 %v1045_v14  ;;  %1946 = vmatprep.mubr.msk.bf16.mxu1 %vm2095_vm3, %v2094_v15 }
 0x260   : > { %1956 = vmatprep.subr.bf16.mxu1 %v2094_v15 }
 0x262   : > { %1941 = vmatmul.mubr.msk.bf16.vlgmr.msra.gmra.mrb[28].mxu0 %vm554_vm2, %v2331_v51 }
 0x263   : > { %1951 = vmatpush3.bf16.msra.mxu0 %v1273_v31  ;;  %1952 = vmatprep.mubr.msk.bf16.mxu0 %vm2095_vm3, %v2094_v15 }
 0x264   : > { %1962 = vmatprep.subr.bf16.mxu0 %v2094_v15 }
 0x266   : > { %1947 = vmatmul.mubr.msk.bf16.vlgmr.msra.gmra.mrb[28].mxu1 %vm554_vm2, %v2329_v50 }
 0x267   : > { %1958 = vmatprep.mubr.msk.bf16.mxu1 %vm2095_vm3, %v2094_v15 }
 0x31d   : > { %v2386_v33 = vpop.f32.mrb[16].mxu0 }
 0x31e   : > { %v1906_v34 = vpop.f32.mrb[17].mxu0  ;;  %v1088_v57 = vsel %vm354_vm0, %v2386_v33, -inf }
 0x31f   : > { %v2388_v35 = vpop.f32.mrb[18].mxu0 }
 0x320   : > { %v1907_v36 = vpop.f32.mrb[19].mxu0  ;;  %v1091_v38 = vsel %vm354_vm0, %v2388_v35, -inf }
 0x321   : > { %1092 = vmax.xlane.f32.xlu1 %v1091_v38  ;;  %v2392_v39 = vpop.f32.mrb[16].mxu1 }
 0x322   : > { %v1912_v41 = vpop.f32.mrb[17].mxu1  ;;  %v1094_v52 = vsel %vm354_vm0, %v2392_v39, -inf }
 0x323   : > { %v2396_v53 = vpop.f32.mrb[18].mxu1  ;;  %1095 = vmax.xlane.f32.xlu0 %v1094_v52 }
 0x324   : > { %v1913_v32 = vpop.f32.mrb[19].mxu1  ;;  %v1097_v7 = vsel %vm354_vm0, %v2396_v53, -inf }
 0x325   : > { %v2398_v54 = vpop.f32.mrb[20].mxu0 }
 0x326   : > { %v1918_v56 = vpop.f32.mrb[21].mxu0  ;;  %v1100_v31 = vsel %vm354_vm0, %v2398_v54, -inf }
 0x327   : > { %v2402_v59 = vpop.f32.mrb[22].mxu0  ;;  %1089 = vmax.xlane.f32.xlu0 %v1088_v57 }
 0x328   : > { %v1919_v4 = vpop.f32.mrb[23].mxu0  ;;  %v1103_v56 = vsel %vm354_vm0, %v2402_v59, -inf }
 0x329   : > { %v2404_v5 = vpop.f32.mrb[20].mxu1 }
 0x32a   : > { %v1924_v49 = vpop.f32.mrb[21].mxu1  ;;  %v1106_v6 = vsel %vm354_vm0, %v2404_v5, -inf }
 0x32b   : > { %1107 = vmax.xlane.f32.xlu1 %v1106_v6  ;;  %v2410_v8 = vpop.f32.mrb[22].mxu1  ;;  %1098 = vmax.xlane.f32.xlu0 %v1097_v7 }
 0x32c   : > { %v1925_v10 = vpop.f32.mrb[23].mxu1  ;;  %v1109_v34 = vsel %vm354_vm0, %v2410_v8, -inf }
 0x32d   : > { %v2412_v11 = vpop.f32.mrb[24].mxu0 }
 0x32e   : > { %v1930_v14 = vpop.f32.mrb[25].mxu0  ;;  %v1112_v7 = vsel %vm354_vm0, %v2412_v11, -inf }
 0x32f   : > { %v2418_v36 = vpop.f32.mrb[26].mxu0  ;;  %1101 = vmax.xlane.f32.xlu1 %v1100_v31  ;;  %1110 = vmax.xlane.f32.xlu0 %v1109_v34 }
 0x330   : > { %v1931_v38 = vpop.f32.mrb[27].mxu0 }
 0x331   : > { %v2420_v41 = vpop.f32.mrb[24].mxu1 }
 0x332   : > { %v1936_v52 = vpop.f32.mrb[25].mxu1  ;;  %v1118_v32 = vsel %vm354_vm0, %v2420_v41, -inf }
 0x333   : > { %1119 = vmax.xlane.f32.xlu1 %v1118_v32  ;;  %v2426_v57 = vpop.f32.mrb[26].mxu1  ;;  %1104 = vmax.xlane.f32.xlu0 %v1103_v56  ;;  %v1115_v32 = vsel %vm354_vm0, %v2418_v36, -inf }
 0x334   : > { %v1937_v4 = vpop.f32.mrb[27].mxu1  ;;  %v1121_v10 = vsel %vm354_vm0, %v2426_v57, -inf }
 0x335   : > { %v2428_v49 = vpop.f32.mrb[28].mxu0 }
 0x336   : > { %v1942_v6 = vpop.f32.mrb[29].mxu0 }
 0x337   : > { %1113 = vmax.xlane.f32.xlu1 %v1112_v7  ;;  %1122 = vmax.xlane.f32.xlu0 %v1121_v10  ;;  %v2434_v14 = vpop.f32.mrb[30].mxu0  ;;  %v1124_v7 = vsel %vm354_vm0, %v2428_v49, -inf }
 0x338   : > { %v1943_v31 = vpop.f32.mrb[31].mxu0  ;;  %v1127_v10 = vsel %vm354_vm0, %v2434_v14, -inf }
 0x339   : > { %v2436_v34 = vpop.f32.mrb[28].mxu1 }
 0x33a   : > { %v1948_v38 = vpop.f32.mrb[29].mxu1  ;;  %v1130_v52 = vsel %vm354_vm0, %v2436_v34, -inf }
 0x33b   : > { %1131 = vmax.xlane.f32.xlu1 %v1130_v52  ;;  %v2442_v56 = vpop.f32.mrb[30].mxu1  ;;  %1116 = vmax.xlane.f32.xlu0 %v1115_v32 }
 0x33c   : > { %v1949_v4 = vpop.f32.mrb[31].mxu1  ;;  %v1133_v6 = vsel %vm354_vm0, %v2442_v56, -inf }
 0x33f   : > { %1134 = vmax.xlane.f32.xlu0 %v1133_v6  ;;  %1125 = vmax.xlane.f32.xlu1 %v1124_v7 }
 0x343   : > { %1128 = vmax.xlane.f32.xlu0 %v1127_v10 }
 0x350   : > { %1366 = vrot.lane.b32.xlu1 %v2315_v3, %s2097_s20 }
 0x354   : > { %1413 = vrot.lane.b32.xlu1 %v2313_v2, %s2097_s20 }
 0x358   : > { %1507 = vrot.lane.b32.xlu1 %v2321_v12, %s2097_s20 }
 0x359   : > { %1319 = vrot.lane.b32.xlu0 %v2308_v48, %s2097_s20 }
 0x35d   : > { %1460 = vrot.lane.b32.xlu0 %v2323_v29, %s2097_s20 }
 0x3ae   : > { %v1093_v32 = vpop.xlane.xlu1 %1092 }
 0x3af   : > { %v1137_v2 = vsub.f32 %v2388_v35, %v1093_v32 }
 0x3b0   : > { %v1096_v31 = vpop.xlane.xlu0 %1095 }
 0x3b1   : > { %v1138_v38 = vsub.f32 %v2392_v39, %v1096_v31  ;;  %v1154_v18 = vmul.f32 1.442695, %v1137_v2 }
 0x3b3   : > { %v1156_v52 = vmul.f32 1.442695, %v1138_v38 }
 0x3b4   : > { %v1090_v4 = vpop.xlane.xlu0 %1089 }
 0x3b5   : > { %2022 = vpow2.f32 %v1156_v52  ;;  %v1136_v3 = vsub.f32 %v2386_v33, %v1090_v4 }
 0x3b7   : > { %v1152_v6 = vmul.f32 1.442695, %v1136_v3 }
 0x3b8   : > { %v1108_v7 = vpop.xlane.xlu1 %1107  ;;  %v1099_v12 = vpop.xlane.xlu0 %1098 }
 0x3b9   : > { %2024 = vpow2.f32 %v1152_v6  ;;  %v1142_v48 = vsub.f32 %v2404_v5, %v1108_v7  ;;  %v1139_v10 = vsub.f32 %v2396_v53, %v1099_v12 }
 0x3bb   : > { %v1164_v29 = vmul.f32 1.442695, %v1142_v48  ;;  %v1158_v22 = vmul.f32 1.442695, %v1139_v10 }
 0x3bc   : > { %v1102_v39 = vpop.xlane.xlu1 %1101  ;;  %v1111_v31 = vpop.xlane.xlu0 %1110 }
 0x3bd   : > { %2026 = vpow2.f32 %v1164_v29  ;;  %v1140_v38 = vsub.f32 %v2398_v54, %v1102_v39  ;;  %v1143_v33 = vsub.f32 %v2410_v8, %v1111_v31 }
 0x3be   : > { %2028 = vpow2.f32 %v1158_v22 }
 0x3bf   : > { %v2467_v52 = vpop.eup %2022  ;;  %v1160_v35 = vmul.f32 1.442695, %v1140_v38  ;;  %2030 = vpow2.f32 %v1154_v18  ;;  %v1166_v32 = vmul.f32 1.442695, %v1143_v33 }
 0x3c0   : > { %v1120_v4 = vpop.xlane.xlu1 %1119  ;;  %v1105_v5 = vpop.xlane.xlu0 %1104  ;;  %v1190_v53 = vsel %vm354_vm0, %v2467_v52, 0.0 }
 0x3c1   : > { %2032 = vpow2.f32 %v1160_v35  ;;  %v1146_v3 = vsub.f32 %v2420_v41, %v1120_v4  ;;  %v1141_v6 = vsub.f32 %v2402_v59, %v1105_v5  ;;  %1191 = vadd.xlane.f32.xlu1 %v1190_v53 }
 0x3c2   : > { %2034 = vpow2.f32 %v1166_v32 }
 0x3c3   : > { %v2473_v54 = vpop.eup %2024  ;;  %v1172_v8 = vmul.f32 1.442695, %v1146_v3  ;;  %v1162_v22 = vmul.f32 1.442695, %v1141_v6 }
 0x3c4   : > { %v1114_v2 = vpop.xlane.xlu1 %1113  ;;  %v1123_v7 = vpop.xlane.xlu0 %1122  ;;  %v1184_v18 = vsel %vm354_vm0, %v2473_v54, 0.0 }
 0x3c5   : > { %2036 = vpow2.f32 %v1172_v8  ;;  %v1144_v12 = vsub.f32 %v2412_v11, %v1114_v2  ;;  %v1147_v48 = vsub.f32 %v2426_v57, %v1123_v7  ;;  %1185 = vadd.xlane.f32.xlu1 %v1184_v18 }
 0x3c6   : > { %2038 = vpow2.f32 %v1162_v22 }
 0x3c7   : > { %v2479_v41 = vpop.eup %2026  ;;  %v1168_v59 = vmul.f32 1.442695, %v1144_v12  ;;  %v1174_v29 = vmul.f32 1.442695, %v1147_v48 }
 0x3c8   : > { %v2481_v10 = vpop.eup %2028  ;;  %v1132_v39 = vpop.xlane.xlu1 %1131  ;;  %v1202_v38 = vsel %vm354_vm0, %v2479_v41, 0.0 }
 0x3c9   : > { %v1117_v31 = vpop.xlane.xlu0 %1116  ;;  %2040 = vpow2.f32 %v1168_v59  ;;  %v1150_v33 = vsub.f32 %v2436_v34, %v1132_v39  ;;  %1203 = vadd.xlane.f32.xlu1 %v1202_v38  ;;  %v1193_v57 = vsel %vm354_vm0, %v2481_v10, 0.0  ;;  %v2489_v35 = vpop.eup %2030 }
 0x3ca   : > { %v1145_v11 = vsub.f32 %v2418_v36, %v1117_v31  ;;  %1194 = vadd.xlane.f32.xlu0 %v1193_v57  ;;  %2042 = vpow2.f32 %v1174_v29  ;;  %v1187_v8 = vsel %vm354_vm0, %v2489_v35, 0.0 }
 0x3cb   : > { %v2491_v32 = vpop.eup %2032  ;;  %v1180_v4 = vmul.f32 1.442695, %v1150_v33 }
 0x3cc   : > { %v1170_v5 = vmul.f32 1.442695, %v1145_v11  ;;  %v1126_v53 = vpop.xlane.xlu1 %1125  ;;  %v1196_v6 = vsel %vm354_vm0, %v2491_v32, 0.0  ;;  %v2499_v22 = vpop.eup %2034 }
 0x3cd   : > { %v1135_v3 = vpop.xlane.xlu0 %1134  ;;  %2044 = vpow2.f32 %v1180_v4  ;;  %v1148_v36 = vsub.f32 %v2428_v49, %v1126_v53  ;;  %1197 = vadd.xlane.f32.xlu1 %v1196_v6 }
 0x3ce   : > { %v1151_v34 = vsub.f32 %v2442_v56, %v1135_v3  ;;  %1188 = vadd.xlane.f32.xlu0 %v1187_v8  ;;  %2046 = vpow2.f32 %v1170_v5  ;;  %v1205_v56 = vsel %vm354_vm0, %v2499_v22, 0.0 }
 0x3cf   : > { %v2501_v2 = vpop.eup %2036  ;;  %v1176_v7 = vmul.f32 1.442695, %v1148_v36 }
 0x3d0   : > { %v1182_v18 = vmul.f32 1.442695, %v1151_v34  ;;  %v1214_v48 = vsel %vm354_vm0, %v2501_v2, 0.0  ;;  %v2508_v59 = vpop.eup %2038 }
 0x3d1   : > { %v1129_v12 = vpop.xlane.xlu0 %1128  ;;  %2048 = vpow2.f32 %v1176_v7  ;;  %1215 = vadd.xlane.f32.xlu1 %v1214_v48  ;;  %v1199_v33 = vsel %vm354_vm0, %v2508_v59, 0.0 }
 0x3d2   : > { %v1149_v49 = vsub.f32 %v2434_v14, %v1129_v12  ;;  %1206 = vadd.xlane.f32.xlu0 %v1205_v56  ;;  %2050 = vpow2.f32 %v1182_v18  ;;  %v1648_v18 = vld [vmem:[#allocation2] sm:$0x1]  ;;  %v1367_v12 = vpop.permute.xlu1 %1366 }
 0x3d3   : > { %v2510_v29 = vpop.eup %2040  ;;  %1999 = vpush %v1648_v18 }
 0x3d4   : > { %v1178_v39 = vmul.f32 1.442695, %v1149_v49  ;;  %v1208_v38 = vsel %vm354_vm0, %v2510_v29, 0.0  ;;  %v2516_v14 = vpop.eup %2042 }
 0x3d5   : > { %v1320_v31 = vpop.permute.xlu0 %1319  ;;  %1209 = vadd.xlane.f32.xlu1 %v1208_v38  ;;  %v1217_v4 = vsel %vm354_vm0, %v2516_v14, 0.0 }
 0x3d6   : > { %1957 = vmatpush3.bf16.msra.mxu1 %v1320_v31  ;;  %1200 = vadd.xlane.f32.xlu0 %v1199_v33  ;;  %2052 = vpow2.f32 %v1178_v39  ;;  %v1414_v48 = vpop.permute.xlu1 %1413 }
 0x3d7   : > { %1968 = vmatprep.subr.bf16.mxu1 %v2094_v15  ;;  %v2519_v11 = vpop.eup %2044 }
 0x3d8   : > { %v1226_v57 = vsel %vm354_vm0, %v2519_v11, 0.0  ;;  %v2525_v5 = vpop.eup %2046 }
 0x3d9   : > { %1227 = vadd.xlane.f32.xlu1 %v1226_v57  ;;  %v1211_v6 = vsel %vm354_vm0, %v2525_v5, 0.0  ;;  %v2545_v31 = vpop.permute.xlu0 %1460 }
 0x3da   : > { %1218 = vadd.xlane.f32.xlu0 %v1217_v4  ;;  %v1508_v49 = vpop.permute.xlu1 %1507 }
 0x3db   : > { %v2527_v53 = vpop.eup %2048 }
 0x3dc   : > { %v1220_v3 = vsel %vm354_vm0, %v2527_v53, 0.0  ;;  %v2533_v36 = vpop.eup %2050 }
 0x3dd   : > { %1221 = vadd.xlane.f32.xlu1 %v1220_v3  ;;  %v1229_v34 = vsel %vm354_vm0, %v2533_v36, 0.0 }
 0x3de   : > { %1212 = vadd.xlane.f32.xlu0 %v1211_v6 }
 0x3e0   : > { %v2537_v8 = vpop.eup %2052 }
 0x3e1   : > { %v1223_v7 = vsel %vm354_vm0, %v2537_v8, 0.0 }
 0x3e2   : > { %1230 = vadd.xlane.f32.xlu0 %v1229_v34 }
 0x3e6   : > { %1224 = vadd.xlane.f32.xlu0 %v1223_v7 }
 0x3ee   : > { %1601 = vrot.lane.b32.xlu1 %v2329_v50, %s2097_s20 }
 0x3fc   : > { %1554 = vrot.lane.b32.xlu0 %v2331_v51, %s2097_s20 }
 0x404   : > { %s2000_s21 = spop %1999 }
 0x44e   : > { %v1192_v56 = vpop.xlane.xlu1 %1191 }
 0x44f   : > { %2054 = vrcp.f32 %v1192_v56 }
 0x452   : > { %v1186_v39 = vpop.xlane.xlu1 %1185 }
 0x456   : > { %v1204_v38 = vpop.xlane.xlu1 %1203 }
 0x457   : > { %v1195_v33 = vpop.xlane.xlu0 %1194 }
 0x458   : > { %2056 = vrcp.f32 %v1195_v33 }
 0x459   : > { %2058 = vrcp.f32 %v1186_v39  ;;  %v2055_v3 = vpop.eup %2054 }
 0x45a   : > { %v1198_v57 = vpop.xlane.xlu1 %1197  ;;  %v1250_v34 = vmul.f32 %v2055_v3, %v2467_v52 }
 0x45b   : > { %v1189_v4 = vpop.xlane.xlu0 %1188 }
 0x45c   : > { %2060 = vrcp.f32 %v1189_v4 }
 0x45d   : > { %2062 = vrcp.f32 %v1204_v38 }
 0x45e   : > { %v1216_v50 = vpop.xlane.xlu1 %1215 }
 0x45f   : > { %v1207_v51 = vpop.xlane.xlu0 %1206 }
 0x460   : > { %2064 = vrcp.f32 %v1207_v51 }
 0x461   : > { %2066 = vrcp.f32 %v1198_v57 }
 0x462   : > { %v2057_v6 = vpop.eup %2056  ;;  %v1210_v18 = vpop.xlane.xlu1 %1209 }
 0x463   : > { %v1251_v7 = vmul.f32 %v2057_v6, %v2481_v10  ;;  %v1201_v56 = vpop.xlane.xlu0 %1200  ;;  %v2059_v20 = vpop.eup %2058 }
 0x464   : > { %2068 = vrcp.f32 %v1201_v56  ;;  %v1248_v4 = vmul.f32 %v2059_v20, %v2473_v54 }
 0x465   : > { %v1265_v33 = vpack.c.bf16 %v1251_v7, %v1250_v34  ;;  %2070 = vrcp.f32 %v1216_v50 }
 0x466   : > { %v2061_v39 = vpop.eup %2060  ;;  %v1228_v52 = vpop.xlane.xlu1 %1227 }
 0x467   : > { %v1249_v38 = vmul.f32 %v2061_v39, %v2489_v35  ;;  %1959 = vmatmul.mubr.msk.bf16.vlgmr.msra.gmra.mrb[32].mxu1 %vm354_vm0, %v1265_v33  ;;  %v1219_v51 = vpop.xlane.xlu0 %1218  ;;  %v2063_v16 = vpop.eup %2062 }
 0x468   : > { %1969 = vmatpush3.bf16.msra.mxu1 %v1414_v48  ;;  %2072 = vrcp.f32 %v1219_v51  ;;  %1970 = vmatprep.mubr.msk.bf16.mxu1 %vm2095_vm3, %v2094_v15  ;;  %v1254_v50 = vmul.f32 %v2063_v16, %v2479_v41 }
 0x469   : > { %v1264_v10 = vpack.c.bf16 %v1249_v38, %v1248_v4  ;;  %1980 = vmatprep.subr.bf16.mxu1 %v2094_v15  ;;  %2074 = vrcp.f32 %v1210_v18 }
 0x46a   : > { %v2065_v57 = vpop.eup %2064  ;;  %v1222_v41 = vpop.xlane.xlu1 %1221 }
 0x46b   : > { %v1255_v20 = vmul.f32 %v2065_v57, %v2499_v22  ;;  %1953 = vmatmul.mubr.msk.bf16.vlgmr.msra.gmra.mrb[32].mxu0 %vm354_vm0, %v1264_v10  ;;  %v1213_v54 = vpop.xlane.xlu0 %1212  ;;  %v2067_v35 = vpop.eup %2066 }
 0x46c   : > { %1963 = vmatpush3.bf16.msra.mxu0 %v1367_v12  ;;  %2076 = vrcp.f32 %v1213_v54  ;;  %1964 = vmatprep.mubr.msk.bf16.mxu0 %vm2095_vm3, %v2094_v15  ;;  %v1252_v6 = vmul.f32 %v2067_v35, %v2491_v32 }
 0x46d   : > { %v1267_v48 = vpack.c.bf16 %v1255_v20, %v1254_v50  ;;  %1974 = vmatprep.subr.bf16.mxu0 %v2094_v15  ;;  %2078 = vrcp.f32 %v1228_v52 }
 0x46e   : > { %v2069_v3 = vpop.eup %2068  ;;  %v1602_v4 = vpop.permute.xlu1 %1601 }
 0x46f   : > { %v1253_v16 = vmul.f32 %v2069_v3, %v2508_v59  ;;  %1971 = vmatmul.mubr.msk.bf16.vlgmr.msra.gmra.mrb[36].mxu1 %vm354_vm0, %v1267_v48  ;;  %v1231_v22 = vpop.xlane.xlu0 %1230  ;;  %v2071_v34 = vpop.eup %2070 }
 0x470   : > { %1981 = vmatpush3.bf16.msra.mxu1 %v1508_v49  ;;  %2080 = vrcp.f32 %v1231_v22  ;;  %1982 = vmatprep.mubr.msk.bf16.mxu1 %vm2095_vm3, %v2094_v15  ;;  %v1258_v18 = vmul.f32 %v2071_v34, %v2501_v2 }
 0x471   : > { %v1266_v12 = vpack.c.bf16 %v1253_v16, %v1252_v6  ;;  %1992 = vmatprep.subr.bf16.mxu1 %v2094_v15  ;;  %2082 = vrcp.f32 %v1222_v41 }
 0x472   : > { %v2073_v7 = vpop.eup %2072 }
 0x473   : > { %v1259_v32 = vmul.f32 %v2073_v7, %v2516_v14  ;;  %1965 = vmatmul.mubr.msk.bf16.vlgmr.msra.gmra.mrb[36].mxu0 %vm354_vm0, %v1266_v12  ;;  %v1225_v59 = vpop.xlane.xlu0 %1224  ;;  %v2075_v56 = vpop.eup %2074 }
 0x474   : > { %1975 = vmatpush3.bf16.msra.mxu0 %v2545_v31  ;;  %2084 = vrcp.f32 %v1225_v59  ;;  %1976 = vmatprep.mubr.msk.bf16.mxu0 %vm2095_vm3, %v2094_v15  ;;  %v1256_v39 = vmul.f32 %v2075_v56, %v2510_v29 }
 0x475   : > { %v1269_v49 = vpack.c.bf16 %v1259_v32, %v1258_v18  ;;  %1986 = vmatprep.subr.bf16.mxu0 %v2094_v15 }
 0x476   : > { %v2077_v33 = vpop.eup %2076 }
 0x477   : > { %v1257_v2 = vmul.f32 %v2077_v33, %v2525_v5  ;;  %1983 = vmatmul.mubr.msk.bf16.vlgmr.msra.gmra.mrb[40].mxu1 %vm354_vm0, %v1269_v49  ;;  %v2079_v14 = vpop.eup %2078  ;;  %v1555_v10 = vpop.permute.xlu0 %1554 }
 0x478   : > { %1993 = vmatpush3.bf16.msra.mxu1 %v1602_v4  ;;  %1994 = vmatprep.mubr.msk.bf16.mxu1 %vm2095_vm3, %v2094_v15  ;;  %v1262_v51 = vmul.f32 %v2079_v14, %v2519_v11 }
 0x479   : > { %v1268_v31 = vpack.c.bf16 %v1257_v2, %v1256_v39 }
 0x47a   : > { %v2081_v38 = vpop.eup %2080 }
 0x47b   : > { %v1263_v52 = vmul.f32 %v2081_v38, %v2533_v36  ;;  %1977 = vmatmul.mubr.msk.bf16.vlgmr.msra.gmra.mrb[40].mxu0 %vm354_vm0, %v1268_v31  ;;  %v2083_v29 = vpop.eup %2082  ;;  %v2588_v36 = vstv %s2000_s21 }
 0x47c   : > { %1987 = vmatpush3.bf16.msra.mxu0 %v1555_v10  ;;  %1988 = vmatprep.mubr.msk.bf16.mxu0 %vm2095_vm3, %v2094_v15  ;;  %v1260_v50 = vmul.f32 %v2083_v29, %v2527_v53 }
 0x47d   : > { %v1271_v5 = vpack.c.bf16 %v1263_v52, %v1262_v51 }
 0x47e   : > { %v2085_v57 = vpop.eup %2084 }
 0x47f   : > { %v1261_v20 = vmul.f32 %v2085_v57, %v2537_v8  ;;  %1995 = vmatmul.mubr.msk.bf16.vlgmr.msra.gmra.mrb[44].mxu1 %vm354_vm0, %v1271_v5 }
 0x481   : > { %v1270_v11 = vpack.c.bf16 %v1261_v20, %v1260_v50 }
 0x483   : > { %1989 = vmatmul.mubr.msk.bf16.vlgmr.msra.gmra.mrb[44].mxu0 %vm354_vm0, %v1270_v11 }
 0x53a   : > { %v1359_v54 = vpop.f32.mrb[32].mxu1 }
 0x53b   : > { %v1653_v35 = vmul.f32 %v2588_v36, %v1359_v54  ;;  %v1960_v48 = vpop.f32.mrb[33].mxu1 }
 0x53c   : > { %v1362_v15 = vpop.f32.mrb[34].mxu1 }
 0x53d   : > { %v1669_v53 = vadd.f32 %v1653_v35, %v524_v30  ;;  %v1654_v8 = vmul.f32 %v2588_v36, %v1362_v15  ;;  %v1961_v3 = vpop.f32.mrb[35].mxu1  ;;  %v2693_v15 = vmax.f32 %v2274_v13, 0.0 }
 0x53e   : > { %v1312_v6 = vpop.f32.mrb[32].mxu0  ;;  %v2694_v3 = vmax.f32 %v2285_v19, 0.0 }
 0x53f   : > { %1685 = vst.msk [vmem:[%s2595_s25 + $0x10] sm:$0xff] %vm554_vm2, %v1669_v53  ;;  %v1670_v16 = vadd.f32 %v1654_v8, %v525_v26  ;;  %v1651_v41 = vmul.f32 %v2588_v36, %v1312_v6  ;;  %v1954_v22 = vpop.f32.mrb[33].mxu0 }
 0x540   : > { %v1315_v34 = vpop.f32.mrb[34].mxu0 }
 0x541   : > { %1686 = vst.msk [vmem:[%s2595_s25 + $0x18] sm:$0xff] %vm554_vm2, %v1670_v16  ;;  %v1667_v23 = vadd.f32 %v1651_v41, %v522_v27  ;;  %v1652_v30 = vmul.f32 %v2588_v36, %v1315_v34  ;;  %v1955_v12 = vpop.f32.mrb[35].mxu0 }
 0x542   : > { %v1453_v7 = vpop.f32.mrb[36].mxu1 }
 0x543   : > { %1683 = vst.msk [vmem:[%s2595_s25] sm:$0xff] %vm554_vm2, %v1667_v23  ;;  %v1668_v24 = vadd.f32 %v1652_v30, %v523_v28  ;;  %v1657_v26 = vmul.f32 %v2588_v36, %v1453_v7  ;;  %v1972_v18 = vpop.f32.mrb[37].mxu1 }
 0x544   : > { %v1456_v32 = vpop.f32.mrb[38].mxu1 }
 0x545   : > { %1684 = vst.msk [vmem:[%s2595_s25 + $0x8] sm:$0xff] %vm554_vm2, %v1668_v24  ;;  %v1673_v21 = vadd.f32 %v1657_v26, %v528_v42  ;;  %v1658_v27 = vmul.f32 %v2588_v36, %v1456_v32  ;;  %v1973_v59 = vpop.f32.mrb[39].mxu1 }
 0x546   : > { %v1406_v56 = vpop.f32.mrb[36].mxu0 }
 0x547   : > { %1689 = vst.msk [vmem:[%s2595_s25 + $0x30] sm:$0xff] %vm554_vm2, %v1673_v21  ;;  %v1674_v25 = vadd.f32 %v1658_v27, %v529_v46  ;;  %v1655_v28 = vmul.f32 %v2588_v36, %v1406_v56  ;;  %v1966_v49 = vpop.f32.mrb[37].mxu0 }
 0x548   : > { %v1409_v33 = vpop.f32.mrb[38].mxu0 }
 0x549   : > { %1690 = vst.msk [vmem:[%s2595_s25 + $0x38] sm:$0xff] %vm554_vm2, %v1674_v25  ;;  %v1671_v37 = vadd.f32 %v1655_v28, %v526_v44  ;;  %v1656_v42 = vmul.f32 %v2588_v36, %v1409_v33  ;;  %v1967_v39 = vpop.f32.mrb[39].mxu0 }
 0x54a   : > { %v1547_v2 = vpop.f32.mrb[40].mxu1 }
 0x54b   : > { %1687 = vst.msk [vmem:[%s2595_s25 + $0x20] sm:$0xff] %vm554_vm2, %v1671_v37  ;;  %v1672_v43 = vadd.f32 %v1656_v42, %v527_v47  ;;  %v1661_v46 = vmul.f32 %v2588_v36, %v1547_v2  ;;  %v1984_v4 = vpop.f32.mrb[41].mxu1 }
 0x54c   : > { %v1550_v14 = vpop.f32.mrb[42].mxu1 }
 0x54d   : > { %1688 = vst.msk [vmem:[%s2595_s25 + $0x28] sm:$0xff] %vm554_vm2, %v1672_v43  ;;  %v1677_v40 = vadd.f32 %v1661_v46, %v532_v60  ;;  %v1662_v44 = vmul.f32 %v2588_v36, %v1550_v14  ;;  %v1985_v31 = vpop.f32.mrb[43].mxu1 }
 0x54e   : > { %v1500_v38 = vpop.f32.mrb[40].mxu0 }
 0x54f   : > { %1693 = vst.msk [vmem:[%s2595_s25 + $0x50] sm:$0xff] %vm554_vm2, %v1677_v40  ;;  %v1678_v45 = vadd.f32 %v1662_v44, %v533_v0  ;;  %v1659_v47 = vmul.f32 %v2588_v36, %v1500_v38  ;;  %v1978_v51 = vpop.f32.mrb[41].mxu0 }
 0x550   : > { %v1503_v52 = vpop.f32.mrb[42].mxu0 }
 0x551   : > { %1694 = vst.msk [vmem:[%s2595_s25 + $0x58] sm:$0xff] %vm554_vm2, %v1678_v45  ;;  %v1675_v55 = vadd.f32 %v1659_v47, %v530_v62  ;;  %v1660_v60 = vmul.f32 %v2588_v36, %v1503_v52  ;;  %v1979_v10 = vpop.f32.mrb[43].mxu0 }
 0x552   : > { %v1641_v29 = vpop.f32.mrb[44].mxu1 }
 0x553   : > { %1691 = vst.msk [vmem:[%s2595_s25 + $0x40] sm:$0xff] %vm554_vm2, %v1675_v55  ;;  %v1676_v61 = vadd.f32 %v1660_v60, %v531_v1  ;;  %v1665_v0 = vmul.f32 %v2588_v36, %v1641_v29  ;;  %v1996_v5 = vpop.f32.mrb[45].mxu1 }
 0x554   : > { %v1644_v57 = vpop.f32.mrb[46].mxu1 }
 0x555   : > { %1692 = vst.msk [vmem:[%s2595_s25 + $0x48] sm:$0xff] %vm554_vm2, %v1676_v61  ;;  %v1681_v62 = vadd.f32 %v1665_v0, %v2691_v58  ;;  %v1666_v50 = vmul.f32 %v2588_v36, %v1644_v57  ;;  %v1997_v20 = vpop.f32.mrb[47].mxu1 }
 0x556   : > { %v1594_v11 = vpop.f32.mrb[44].mxu0 }
 0x557   : > { %1697 = vst.msk [vmem:[%s2595_s25 + $0x70] sm:$0xff] %vm554_vm2, %v1681_v62  ;;  %v1682_v1 = vadd.f32 %v1666_v50, %v2692_v63  ;;  %v1663_v54 = vmul.f32 %v2588_v36, %v1594_v11  ;;  %v1990_v35 = vpop.f32.mrb[45].mxu0 }
 0x558   : > { %v1597_v48 = vpop.f32.mrb[46].mxu0 }
 0x559   : > { %1698 = vst.msk [vmem:[%s2595_s25 + $0x78] sm:$0xff] %vm554_vm2, %v1682_v1  ;;  %v1679_v9 = vadd.f32 %v1663_v54, %v2693_v15  ;;  %v1664_v53 = vmul.f32 %v2588_v36, %v1597_v48  ;;  %v1991_v8 = vpop.f32.mrb[47].mxu0 }
 0x55b   : > { %1695 = vst.msk [vmem:[%s2595_s25 + $0x60] sm:$0xff] %vm554_vm2, %v1679_v9  ;;  %v1680_v6 = vadd.f32 %v1664_v53, %v2694_v3 }
 0x55d   : > { %1696 = vst.msk [vmem:[%s2595_s25 + $0x68] sm:$0xff] %vm554_vm2, %v1680_v6 }
 0x55e PF: > { %s19_s26 = sadd.s32 1, %s2092_s26  }
 0x55f   : > { %p16_p4 = scmp.ge.s32.totalorder %s19_s26, 6  }
 0x561   :  { %18 = sbr.rel (!%p16_p4) target bundleno = 3 (0x3), region = 78 }

// kernel: axial_block_dynamic.3
= control target key start
LH: loop header
LB: loop body
LE: loop exit
PB: predicated region body
PF: predicated region fallthrough
CT: control target
= control target key end

     0   :  { %s2212_s29 = smov 0   ;;  %s2718_s0 = inlined_call_operand.vmem [shape: f32[32,16,8], index: 0, kind: input, shape index: {}]   ;;  %s2719_s1 = inlined_call_operand.vmem [shape: f32[32,16,16], index: 1, kind: input, shape index: {}]   ;;  %s2720_s2 = inlined_call_operand.vmem [shape: bf16[8,24], index: 2, kind: input, shape index: {}]   ;;  %s2721_s3 = inlined_call_operand.vmem [shape: f32[1,24], index: 3, kind: input, shape index: {}]   ;;  %s2722_s4 = inlined_call_operand.<no memory space> [shape: f32[1,1], index: 4, kind: input, shape index: {}]   ;;  %s2723_s5 = inlined_call_operand.vmem [shape: bf16[8,16], index: 5, kind: input, shape index: {}]   ;;  %s2724_s6 = inlined_call_operand.vmem [shape: f32[1,16], index: 6, kind: input, shape index: {}]   ;;  %s2725_s7 = inlined_call_operand.vmem [shape: f32[1,16], index: 7, kind: input, shape index: {}]   ;;  %s2726_s8 = inlined_call_operand.vmem [shape: f32[32,16,16], index: 8, kind: output, shape index: {}]  }
   0x1   :  { %v13_v0 = vstv %s2722_s4 }
   0x2   :  { %14 = vst [vmem:[#allocation2] sm:$0x1] %v13_v0 }
   0x3 LB: > { %s1833_s30 = sadd.s32 4294967295, %s2158_s29   ;;  %p1837_p0 = scmp.ge.s32.totalorder %s2158_s29, 1  ;;  %s2158_s29 = sphi %s2212_s29, %s20_s29  }
   0x4   : > { %p278_p1 = scmp.lt.s32.totalorder %s2158_s29, 5 }
   0x6   : > { %p279_p2 = pnand %p1837_p0, %p278_p1 }
   0x7   : > { %v366_v1 = vld [vmem:[%s2720_s2] sm:$0xf] (!%p279_p2)  ;;  %vm399_vm0 = vcmask (!%p279_p2), 1043456   ;;  %s1838_s4 = sshll.u32 (!%p279_p2), %s1833_s30, 3  ;;  %vm374_vm1 = vcmask (!%p279_p2), 64512   ;;  %v2160_v27 = vmov (!%p279_p2), 0.0  }
   0x8   : > { %282 = sbr.rel (%p279_p2) target bundleno = 1431 (0x597), region = 52  ;;  %2071 = vmatprep.subr.msk.bf16.mxu0 (!%p279_p2), %vm399_vm0, %v366_v1  ;;  %v401_v2 = vsel (!%p279_p2), %vm399_vm0, %v366_v1, 0  ;;  %p321_p3 = scmp.lt.s32.totalorder (!%p279_p2), %s1838_s4, 31  ;;  %2072 = vmatprep.subr.msk.bf16.mxu1 (!%p279_p2), %vm399_vm0, %v366_v1  ;;  %v1847_v29 = vld [vmem:[%s2721_s3] ss:$0 sm:$0xff] (!%p279_p2)  ;;  %vm2161_vm2 = vmmov (!%p279_p2), 0  }
   0x9   : > { %1938 = vmatpush3.bf16.msra.mxu0 (!%p279_p2), %v401_v2  ;;  %2070 = vmatpush3.bf16.msra.mxu1 (!%p279_p2), %v401_v2  ;;  %s2162_s17 = smov (!%p279_p2), 120   ;;  %s2163_s18 = smov (!%p279_p2), 112   ;;  %vm908_vm3 = vcmask (!%p279_p2), 130048  }
   0xa   : > { %1955 = vmatprep.subr.bf16.mxu1 (!%p279_p2), %v2160_v27  ;;  %1979 = vmatprep.subr.bf16.mxu0 (!%p279_p2), %v2160_v27 }
   0xf   : > { %s2728_s4 = smov (!%p321_p3, %s1838_s4), 31 }
  0x10   : > { %s2226_s11 = sshll.u32 %s2728_s4, 4 }
  0x11   : > { %s325_s14 = scalar_lea.vmem %s2718_s0, %s2226_s11  ;;  %s2622_s26 = scalar_lea.vmem %s2719_s1, %s2226_s11 }
  0x12   : > { %v2232_v3 = vld [vmem:[%s325_s14] sm:$0xff]  ;;  %v2234_v4 = vld [vmem:[%s325_s14 + $0x8] sm:$0xff]  ;;  %v2236_v5 = vld [vmem:[%s325_s14 + $0x10] sm:$0xff]  ;;  %s2644_s10 = scalar_lea.vmem %s2726_s8, %s2226_s11 }
  0x13   : > { %v358_v6 = vpack.c.bf16 %v2234_v4, %v2232_v3  ;;  %v2240_v7 = vld [vmem:[%s325_s14 + $0x18] sm:$0xff]  ;;  %v2242_v8 = vld [vmem:[%s325_s14 + $0x40] sm:$0xff]  ;;  %v2244_v9 = vld [vmem:[%s325_s14 + $0x48] sm:$0xff] }
  0x14   : > { %v359_v10 = vpack.c.bf16 %v2240_v7, %v2236_v5  ;;  %v362_v11 = vpack.c.bf16 %v2244_v9, %v2242_v8  ;;  %v2250_v12 = vld [vmem:[%s325_s14 + $0x50] sm:$0xff]  ;;  %v2252_v13 = vld [vmem:[%s325_s14 + $0x58] sm:$0xff]  ;;  %v2254_v14 = vld [vmem:[%s325_s14 + $0x20] sm:$0xff] }
  0x15   : > { %1939 = vmatprep.mubr.msk.bf16.mxu0 %vm374_vm1, %v358_v6  ;;  %v363_v15 = vpack.c.bf16 %v2252_v13, %v2250_v12  ;;  %v2259_v16 = vld [vmem:[%s325_s14 + $0x28] sm:$0xff]  ;;  %v2265_v18 = vld [vmem:[%s325_s14 + $0x60] sm:$0xff]  ;;  %v2270_v20 = vld [vmem:[%s325_s14 + $0x30] sm:$0xff] }
  0x16   : > { %1940 = vmatmul.mubr.msk.bf16.vlgmr.msra.gmra.mrb[0].mxu0 %vm374_vm1, %v359_v10  ;;  %1947 = vmatprep.mubr.msk.bf16.mxu1 %vm374_vm1, %v362_v11  ;;  %v360_v17 = vpack.c.bf16 %v2259_v16, %v2254_v14  ;;  %v2267_v19 = vld [vmem:[%s325_s14 + $0x68] sm:$0xff]  ;;  %v2272_v21 = vld [vmem:[%s325_s14 + $0x38] sm:$0xff]  ;;  %v2277_v23 = vld [vmem:[%s325_s14 + $0x70] sm:$0xff] }
  0x17   : > { %1948 = vmatmul.mubr.msk.bf16.vlgmr.msra.gmra.mrb[0].mxu1 %vm374_vm1, %v363_v15  ;;  %v364_v22 = vpack.c.bf16 %v2267_v19, %v2265_v18  ;;  %v2279_v24 = vld [vmem:[%s325_s14 + $0x78] sm:$0xff]  ;;  %v361_v25 = vpack.c.bf16 %v2272_v21, %v2270_v20 }
  0x18   : > { %1943 = vmatprep.mubr.msk.bf16.mxu0 %vm374_vm1, %v360_v17  ;;  %v365_v26 = vpack.c.bf16 %v2279_v24, %v2277_v23 }
  0x19   : > { %1951 = vmatprep.mubr.msk.bf16.mxu1 %vm374_vm1, %v364_v22 }
  0x1e   : > { %1944 = vmatmul.mubr.msk.bf16.gmra.mrb[4].mxu0 %vm374_vm1, %v361_v25 }
  0x1f   : > { %1952 = vmatmul.mubr.msk.bf16.gmra.mrb[4].mxu1 %vm374_vm1, %v365_v26  ;;  %1981 = vmatprep.mubr.msk.bf16.mxu0 %vm2161_vm2, %v2160_v27 }
  0x20   : > { %1957 = vmatprep.mubr.msk.bf16.mxu1 %vm2161_vm2, %v2160_v27 }
  0xe9   : > { %v1941_v28 = vpop.f32.mrb[0].mxu0 }
  0xea   : > { %v437_v30 = vpop.f32.mrb[1].mxu0  ;;  %v1949_v31 = vpop.f32.mrb[0].mxu1  ;;  %v446_v35 = vadd.f32 %v1941_v28, %v1847_v29 }
  0xeb   : > { %v1942_v32 = vpop.f32.mrb[2].mxu0  ;;  %v478_v33 = vadd.f32 %v1949_v31, %v1847_v29  ;;  %v469_v34 = vpop.f32.mrb[1].mxu1  ;;  %v438_v40 = vadd.f32 %v1847_v29, %v437_v30 }
  0xec   : > { %v449_v36 = vadd.f32 %v1942_v32, %v1847_v29  ;;  %v440_v37 = vpop.f32.mrb[3].mxu0  ;;  %v470_v38 = vadd.f32 %v1847_v29, %v469_v34  ;;  %v1950_v39 = vpop.f32.mrb[2].mxu1 }
  0xed   : > { %v441_v41 = vadd.f32 %v1847_v29, %v440_v37  ;;  %v481_v42 = vadd.f32 %v1950_v39, %v1847_v29  ;;  %v472_v43 = vpop.f32.mrb[3].mxu1 }
  0xee   : > { %v2297_v44 = vpack.c.bf16 %v449_v36, %v446_v35  ;;  %v473_v45 = vadd.f32 %v1847_v29, %v472_v43 }
  0xef   : > { %v500_v46 = vpack.c.bf16 %v441_v41, %v438_v40  ;;  %v2299_v47 = vpack.c.bf16 %v481_v42, %v478_v33 }
  0xf0   : > { %v2301_v48 = vpack.c.bf16 %v473_v45, %v470_v38 }
  0xf1   : > { %v1945_v49 = vpop.f32.mrb[4].mxu0  ;;  %509 = vrot.lane.b32.xlu0 %v500_v46, %s2162_s17 }
  0xf2   : > { %v462_v50 = vadd.f32 %v1945_v49, %v1847_v29  ;;  %v453_v51 = vpop.f32.mrb[5].mxu0  ;;  %v1953_v52 = vpop.f32.mrb[4].mxu1 }
  0xf3   : > { %v454_v53 = vadd.f32 %v1847_v29, %v453_v51  ;;  %v1946_v54 = vpop.f32.mrb[6].mxu0  ;;  %v494_v55 = vadd.f32 %v1953_v52, %v1847_v29  ;;  %v485_v56 = vpop.f32.mrb[5].mxu1 }
  0xf4   : > { %v465_v57 = vadd.f32 %v1946_v54, %v1847_v29  ;;  %v456_v58 = vpop.f32.mrb[7].mxu0  ;;  %v486_v59 = vadd.f32 %v1847_v29, %v485_v56  ;;  %v1954_v60 = vpop.f32.mrb[6].mxu1 }
  0xf5   : > { %v457_v61 = vadd.f32 %v1847_v29, %v456_v58  ;;  %559 = vrot.lane.b32.xlu0 %v2297_v44, %s2162_s17  ;;  %v497_v62 = vadd.f32 %v1954_v60, %v1847_v29  ;;  %v488_v63 = vpop.f32.mrb[7].mxu1 }
  0xf6   : > { %v2304_v0 = vpack.c.bf16 %v465_v57, %v462_v50  ;;  %v489_v1 = vadd.f32 %v1847_v29, %v488_v63 }
  0xf7   : > { %v2306_v2 = vpack.c.bf16 %v457_v61, %v454_v53  ;;  %v2308_v6 = vpack.c.bf16 %v497_v62, %v494_v55 }
  0xf8   : > { %v2310_v10 = vpack.c.bf16 %v489_v1, %v486_v59 }
  0xf9   : > { %609 = vrot.lane.b32.xlu1 %v2306_v2, %s2162_s17  ;;  %709 = vrot.lane.b32.xlu0 %v2301_v48, %s2162_s17 }
  0xfd   : > { %659 = vrot.lane.b32.xlu1 %v2304_v0, %s2162_s17  ;;  %809 = vrot.lane.b32.xlu0 %v2310_v10, %s2162_s17 }
 0x101   : > { %759 = vrot.lane.b32.xlu1 %v2299_v47, %s2162_s17 }
 0x105   : > { %859 = vrot.lane.b32.xlu1 %v2308_v6, %s2162_s17 }
 0x109   : > { %1093 = vrot.lane.b32.xlu1 %v500_v46, %s2163_s18 }
 0x163   : > { %v510_v11 = vpop.permute.xlu0 %509 }
 0x164   : > { %v515_v15 = vsel %vm374_vm1, %v510_v11, 0 }
 0x165   : > { %1956 = vmatpush3.bf16.xpose.msra.mxu1 %v515_v15 }
 0x166   : > { %1961 = vmatprep.subr.bf16.mxu1 %v2160_v27 }
 0x167   : > { %v560_v17 = vpop.permute.xlu0 %559 }
 0x168   : > { %v565_v26 = vsel %vm374_vm1, %v560_v17, 0 }
 0x16b   : > { %v610_v22 = vpop.permute.xlu1 %609  ;;  %v710_v25 = vpop.permute.xlu0 %709 }
 0x16c   : > { %v715_v28 = vsel %vm374_vm1, %v710_v25, 0  ;;  %1958 = vmatmul.mubr.msk.bf16.vlgmr.msra.gmra.mrb[8].mxu1 %vm374_vm1, %v500_v46  ;;  %v615_v31 = vsel %vm374_vm1, %v610_v22, 0 }
 0x16d   : > { %1962 = vmatpush3.bf16.xpose.msra.mxu1 %v565_v26  ;;  %1980 = vmatpush3.bf16.xpose.msra.mxu0 %v715_v28 }
 0x16e   : > { %1963 = vmatprep.mubr.msk.bf16.mxu1 %vm2161_vm2, %v2160_v27  ;;  %1967 = vmatprep.subr.bf16.mxu1 %v2160_v27 }
 0x16f   : > { %v660_v29 = vpop.permute.xlu1 %659  ;;  %v810_v30 = vpop.permute.xlu0 %809  ;;  %1991 = vmatprep.subr.bf16.mxu0 %v2160_v27 }
 0x170   : > { %v815_v32 = vsel %vm374_vm1, %v810_v30, 0  ;;  %v665_v36 = vsel %vm374_vm1, %v660_v29, 0 }
 0x173   : > { %v760_v33 = vpop.permute.xlu1 %759 }
 0x174   : > { %1964 = vmatmul.mubr.msk.bf16.vlgmr.msra.gmra.mrb[12].mxu1 %vm374_vm1, %v2297_v44  ;;  %1982 = vmatmul.mubr.msk.bf16.vlgmr.msra.gmra.mrb[8].mxu0 %vm374_vm1, %v2301_v48  ;;  %v765_v37 = vsel %vm374_vm1, %v760_v33, 0 }
 0x175   : > { %1968 = vmatpush3.bf16.xpose.msra.mxu1 %v615_v31  ;;  %1992 = vmatpush3.bf16.xpose.msra.mxu0 %v815_v32 }
 0x176   : > { %1969 = vmatprep.mubr.msk.bf16.mxu1 %vm2161_vm2, %v2160_v27  ;;  %1993 = vmatprep.mubr.msk.bf16.mxu0 %vm2161_vm2, %v2160_v27 }
 0x177   : > { %v860_v34 = vpop.permute.xlu1 %859  ;;  %1973 = vmatprep.subr.bf16.mxu1 %v2160_v27  ;;  %2003 = vmatprep.subr.bf16.mxu0 %v2160_v27 }
 0x178   : > { %v865_v38 = vsel %vm374_vm1, %v860_v34, 0 }
 0x17b   : > { %v1094_v35 = vpop.permute.xlu1 %1093 }
 0x17c   : > { %1970 = vmatmul.mubr.msk.bf16.vlgmr.msra.gmra.mrb[16].mxu1 %vm374_vm1, %v2306_v2  ;;  %1994 = vmatmul.mubr.msk.bf16.vlgmr.msra.gmra.mrb[12].mxu0 %vm374_vm1, %v2310_v10 }
 0x17d   : > { %1974 = vmatpush3.bf16.xpose.msra.mxu1 %v665_v36  ;;  %2004 = vmatpush3.bf16.msra.mxu0 %v1094_v35 }
 0x17e   : > { %1975 = vmatprep.mubr.msk.bf16.mxu1 %vm2161_vm2, %v2160_v27  ;;  %1985 = vmatprep.subr.bf16.mxu1 %v2160_v27 }
 0x17f   : > { %2005 = vmatprep.mubr.msk.bf16.mxu0 %vm2161_vm2, %v2160_v27  ;;  %2015 = vmatprep.subr.bf16.mxu0 %v2160_v27 }
 0x184   : > { %1976 = vmatmul.mubr.msk.bf16.vlgmr.msra.gmra.mrb[20].mxu1 %vm374_vm1, %v2304_v0 }
 0x185   : > { %1986 = vmatpush3.bf16.xpose.msra.mxu1 %v765_v37  ;;  %1987 = vmatprep.mubr.msk.bf16.mxu1 %vm2161_vm2, %v2160_v27 }
 0x186   : > { %1997 = vmatprep.subr.bf16.mxu1 %v2160_v27 }
 0x18c   : > { %1988 = vmatmul.mubr.msk.bf16.vlgmr.msra.gmra.mrb[24].mxu1 %vm374_vm1, %v2299_v47 }
 0x18d   : > { %1998 = vmatpush3.bf16.xpose.msra.mxu1 %v865_v38  ;;  %1999 = vmatprep.mubr.msk.bf16.mxu1 %vm2161_vm2, %v2160_v27 }
 0x18e   : > { %2009 = vmatprep.subr.bf16.mxu1 %v2160_v27 }
 0x194   : > { %2000 = vmatmul.mubr.msk.bf16.vlgmr.msra.gmra.mrb[28].mxu1 %vm374_vm1, %v2308_v6 }
 0x195   : > { %2011 = vmatprep.mubr.msk.bf16.mxu1 %vm2161_vm2, %v2160_v27 }
 0x23f   : > { %v2367_v39 = vpop.f32.mrb[8].mxu1 }
 0x240   : > { %v1959_v40 = vpop.f32.mrb[9].mxu1  ;;  %v909_v41 = vsel %vm908_vm3, %v2367_v39, -inf }
 0x241   : > { %910 = vmax.xlane.f32.xlu0 %v909_v41  ;;  %v2371_v42 = vpop.f32.mrb[10].mxu1 }
 0x242   : > { %v1960_v43 = vpop.f32.mrb[11].mxu1  ;;  %v912_v57 = vsel %vm908_vm3, %v2371_v42, -inf }
 0x247   : > { %v2373_v45 = vpop.f32.mrb[12].mxu1  ;;  %v2375_v46 = vpop.f32.mrb[8].mxu0 }
 0x248   : > { %v1965_v49 = vpop.f32.mrb[13].mxu1  ;;  %v1983_v50 = vpop.f32.mrb[9].mxu0  ;;  %v933_v51 = vsel %vm908_vm3, %v2375_v46, -inf  ;;  %v915_v58 = vsel %vm908_vm3, %v2373_v45, -inf }
 0x249   : > { %v2379_v52 = vpop.f32.mrb[14].mxu1  ;;  %934 = vmax.xlane.f32.xlu1 %v933_v51  ;;  %v2381_v53 = vpop.f32.mrb[10].mxu0 }
 0x24a   : > { %v1966_v54 = vpop.f32.mrb[15].mxu1  ;;  %v1984_v55 = vpop.f32.mrb[11].mxu0  ;;  %v936_v56 = vsel %vm908_vm3, %v2381_v53, -inf  ;;  %v918_v22 = vsel %vm908_vm3, %v2379_v52, -inf }
 0x24b   : > { %937 = vmax.xlane.f32.xlu0 %v936_v56 }
 0x24d   : > { %913 = vmax.xlane.f32.xlu1 %v912_v57 }
 0x24f   : > { %v2389_v59 = vpop.f32.mrb[16].mxu1  ;;  %916 = vmax.xlane.f32.xlu0 %v915_v58  ;;  %v2391_v60 = vpop.f32.mrb[12].mxu0 }
 0x250   : > { %v1971_v61 = vpop.f32.mrb[17].mxu1  ;;  %v1995_v62 = vpop.f32.mrb[13].mxu0  ;;  %v945_v63 = vsel %vm908_vm3, %v2391_v60, -inf  ;;  %v921_v25 = vsel %vm908_vm3, %v2389_v59, -inf }
 0x251   : > { %v2395_v1 = vpop.f32.mrb[18].mxu1  ;;  %946 = vmax.xlane.f32.xlu1 %v945_v63  ;;  %v2397_v11 = vpop.f32.mrb[14].mxu0 }
 0x252   : > { %v1972_v15 = vpop.f32.mrb[19].mxu1  ;;  %v1996_v17 = vpop.f32.mrb[15].mxu0  ;;  %v948_v26 = vsel %vm908_vm3, %v2397_v11, -inf  ;;  %v924_v33 = vsel %vm908_vm3, %v2395_v1, -inf }
 0x253   : > { %919 = vmax.xlane.f32.xlu0 %v918_v22 }
 0x255   : > { %922 = vmax.xlane.f32.xlu1 %v921_v25 }
 0x257   : > { %v2405_v28 = vpop.f32.mrb[20].mxu1  ;;  %949 = vmax.xlane.f32.xlu0 %v948_v26 }
 0x258   : > { %v1977_v29 = vpop.f32.mrb[21].mxu1  ;;  %v927_v30 = vsel %vm908_vm3, %v2405_v28, -inf }
 0x259   : > { %v2409_v31 = vpop.f32.mrb[22].mxu1  ;;  %928 = vmax.xlane.f32.xlu1 %v927_v30 }
 0x25a   : > { %v1978_v32 = vpop.f32.mrb[23].mxu1  ;;  %v930_v34 = vsel %vm908_vm3, %v2409_v31, -inf }
 0x25b   : > { %925 = vmax.xlane.f32.xlu0 %v924_v33 }
 0x25f   : > { %v2415_v35 = vpop.f32.mrb[24].mxu1  ;;  %931 = vmax.xlane.f32.xlu0 %v930_v34 }
 0x260   : > { %v1989_v36 = vpop.f32.mrb[25].mxu1  ;;  %v939_v37 = vsel %vm908_vm3, %v2415_v35, -inf }
 0x261   : > { %v2419_v38 = vpop.f32.mrb[26].mxu1  ;;  %940 = vmax.xlane.f32.xlu1 %v939_v37 }
 0x262   : > { %v1990_v40 = vpop.f32.mrb[27].mxu1  ;;  %v942_v41 = vsel %vm908_vm3, %v2419_v38, -inf }
 0x263   : > { %943 = vmax.xlane.f32.xlu0 %v942_v41 }
 0x267   : > { %v2423_v43 = vpop.f32.mrb[28].mxu1 }
 0x268   : > { %v2001_v49 = vpop.f32.mrb[29].mxu1  ;;  %v951_v50 = vsel %vm908_vm3, %v2423_v43, -inf }
 0x269   : > { %v2427_v51 = vpop.f32.mrb[30].mxu1  ;;  %952 = vmax.xlane.f32.xlu1 %v951_v50 }
 0x26a   : > { %v2002_v54 = vpop.f32.mrb[31].mxu1  ;;  %v954_v55 = vsel %vm908_vm3, %v2427_v51, -inf }
 0x26b   : > { %955 = vmax.xlane.f32.xlu0 %v954_v55 }
 0x27a   : > { %1187 = vrot.lane.b32.xlu1 %v2306_v2, %s2163_s18 }
 0x27e   : > { %1234 = vrot.lane.b32.xlu1 %v2304_v0, %s2163_s18 }
 0x281   : > { %1140 = vrot.lane.b32.xlu0 %v2297_v44, %s2163_s18 }
 0x2ce   : > { %v911_v56 = vpop.xlane.xlu0 %910 }
 0x2cf   : > { %v957_v57 = vsub.f32 %v2367_v39, %v911_v56 }
 0x2d1   : > { %v973_v58 = vmul.f32 1.442695, %v957_v57 }
 0x2d3   : > { %2088 = vpow2.f32 %v973_v58 }
 0x2d6   : > { %v935_v61 = vpop.xlane.xlu1 %934 }
 0x2d7   : > { %v965_v62 = vsub.f32 %v2375_v46, %v935_v61 }
 0x2d8   : > { %v938_v63 = vpop.xlane.xlu0 %937 }
 0x2d9   : > { %v989_v15 = vmul.f32 1.442695, %v965_v62  ;;  %v966_v17 = vsub.f32 %v2381_v53, %v938_v63 }
 0x2da   : > { %v914_v22 = vpop.xlane.xlu1 %913 }
 0x2db   : > { %2090 = vpow2.f32 %v989_v15  ;;  %v958_v2 = vsub.f32 %v2371_v42, %v914_v22  ;;  %v991_v0 = vmul.f32 1.442695, %v966_v17 }
 0x2dc   : > { %v917_v25 = vpop.xlane.xlu0 %916 }
 0x2dd   : > { %v2441_v26 = vpop.eup %2088  ;;  %v975_v44 = vmul.f32 1.442695, %v958_v2  ;;  %v959_v39 = vsub.f32 %v2373_v45, %v917_v25 }
 0x2de   : > { %v947_v29 = vpop.xlane.xlu1 %946  ;;  %v1005_v30 = vsel %vm908_vm3, %v2441_v26, 0.0 }
 0x2df   : > { %2092 = vpow2.f32 %v975_v44  ;;  %v977_v46 = vmul.f32 1.442695, %v959_v39  ;;  %v969_v32 = vsub.f32 %v2391_v60, %v947_v29  ;;  %1006 = vadd.xlane.f32.xlu1 %v1005_v30 }
 0x2e0   : > { %2094 = vpow2.f32 %v991_v0  ;;  %v920_v53 = vpop.xlane.xlu0 %919 }
 0x2e1   : > { %2096 = vpow2.f32 %v977_v46  ;;  %v997_v42 = vmul.f32 1.442695, %v969_v32  ;;  %v960_v33 = vsub.f32 %v2379_v52, %v920_v53 }
 0x2e2   : > { %v923_v34 = vpop.xlane.xlu1 %922 }
 0x2e3   : > { %2098 = vpow2.f32 %v997_v42  ;;  %v979_v36 = vmul.f32 1.442695, %v960_v33  ;;  %v961_v45 = vsub.f32 %v2389_v59, %v923_v34 }
 0x2e4   : > { %v950_v37 = vpop.xlane.xlu0 %949 }
 0x2e5   : > { %v2449_v40 = vpop.eup %2090  ;;  %2100 = vpow2.f32 %v979_v36  ;;  %v981_v41 = vmul.f32 1.442695, %v961_v45  ;;  %v970_v49 = vsub.f32 %v2397_v11, %v950_v37 }
 0x2e6   : > { %v929_v60 = vpop.xlane.xlu1 %928  ;;  %v1029_v50 = vsel %vm908_vm3, %v2449_v40, 0.0 }
 0x2e7   : > { %2102 = vpow2.f32 %v981_v41  ;;  %v999_v54 = vmul.f32 1.442695, %v970_v49  ;;  %v963_v52 = vsub.f32 %v2405_v28, %v929_v60  ;;  %1030 = vadd.xlane.f32.xlu1 %v1029_v50 }
 0x2e8   : > { %v926_v55 = vpop.xlane.xlu0 %925 }
 0x2e9   : > { %v2455_v56 = vpop.eup %2092  ;;  %2104 = vpow2.f32 %v999_v54  ;;  %v985_v59 = vmul.f32 1.442695, %v963_v52  ;;  %v962_v57 = vsub.f32 %v2395_v1, %v926_v55 }
 0x2ea   : > { %v2458_v58 = vpop.eup %2094  ;;  %v1008_v11 = vsel %vm908_vm3, %v2455_v56, 0.0 }
 0x2eb   : > { %v2462_v61 = vpop.eup %2096  ;;  %2106 = vpow2.f32 %v985_v59  ;;  %v983_v62 = vmul.f32 1.442695, %v962_v57  ;;  %1009 = vadd.xlane.f32.xlu0 %v1008_v11  ;;  %v1032_v1 = vsel %vm908_vm3, %v2458_v58, 0.0 }
 0x2ec   : > { %v932_v63 = vpop.xlane.xlu0 %931  ;;  %v1011_v28 = vsel %vm908_vm3, %v2462_v61, 0.0 }
 0x2ed   : > { %v2466_v15 = vpop.eup %2098  ;;  %2108 = vpow2.f32 %v983_v62  ;;  %v964_v17 = vsub.f32 %v2409_v31, %v932_v63  ;;  %1012 = vadd.xlane.f32.xlu1 %v1011_v28  ;;  %v1469_v63 = vld [vmem:[#allocation2] sm:$0x1] }
 0x2ee   : > { %v1041_v0 = vsel %vm908_vm3, %v2466_v15, 0.0  ;;  %v941_v37 = vpop.xlane.xlu1 %940  ;;  %2074 = vpush %v1469_v63 }
 0x2ef   : > { %v2471_v22 = vpop.eup %2100  ;;  %v987_v2 = vmul.f32 1.442695, %v964_v17  ;;  %1033 = vadd.xlane.f32.xlu0 %v1032_v1  ;;  %v967_v41 = vsub.f32 %v2415_v35, %v941_v37 }
 0x2f0   : > { %v1014_v44 = vsel %vm908_vm3, %v2471_v22, 0.0  ;;  %v944_v31 = vpop.xlane.xlu0 %943 }
 0x2f1   : > { %v2475_v25 = vpop.eup %2102  ;;  %2110 = vpow2.f32 %v987_v2  ;;  %1042 = vadd.xlane.f32.xlu1 %v1041_v0  ;;  %v993_v60 = vmul.f32 1.442695, %v967_v41  ;;  %v968_v54 = vsub.f32 %v2419_v38, %v944_v31 }
 0x2f2   : > { %v1017_v29 = vsel %vm908_vm3, %v2475_v25, 0.0 }
 0x2f3   : > { %v2479_v39 = vpop.eup %2104  ;;  %1015 = vadd.xlane.f32.xlu0 %v1014_v44  ;;  %2112 = vpow2.f32 %v993_v60  ;;  %v995_v55 = vmul.f32 1.442695, %v968_v54 }
 0x2f4   : > { %v1044_v46 = vsel %vm908_vm3, %v2479_v39, 0.0 }
 0x2f5   : > { %v2483_v30 = vpop.eup %2106  ;;  %1018 = vadd.xlane.f32.xlu1 %v1017_v29 }
 0x2f6   : > { %v1023_v42 = vsel %vm908_vm3, %v2483_v30, 0.0  ;;  %v953_v49 = vpop.xlane.xlu1 %952 }
 0x2f7   : > { %v2487_v32 = vpop.eup %2108  ;;  %1045 = vadd.xlane.f32.xlu0 %v1044_v46  ;;  %v971_v50 = vsub.f32 %v2423_v43, %v953_v49 }
 0x2f8   : > { %v956_v53 = vpop.xlane.xlu0 %955  ;;  %v1020_v33 = vsel %vm908_vm3, %v2487_v32, 0.0 }
 0x2f9   : > { %1024 = vadd.xlane.f32.xlu1 %v1023_v42  ;;  %v1001_v52 = vmul.f32 1.442695, %v971_v50  ;;  %v972_v59 = vsub.f32 %v2427_v51, %v956_v53 }
 0x2fa   : > { %v1188_v28 = vpop.permute.xlu1 %1187 }
 0x2fb   : > { %v2493_v34 = vpop.eup %2110  ;;  %1021 = vadd.xlane.f32.xlu0 %v1020_v33  ;;  %2114 = vpow2.f32 %v1001_v52 }
 0x2fc   : > { %v1141_v36 = vpop.permute.xlu0 %1140  ;;  %v1026_v45 = vsel %vm908_vm3, %v2493_v34, 0.0  ;;  %2116 = vpow2.f32 %v995_v55 }
 0x2fd   : > { %2010 = vmatpush3.bf16.msra.mxu1 %v1141_v36  ;;  %v2506_v57 = vpop.eup %2112 }
 0x2fe   : > { %2021 = vmatprep.subr.bf16.mxu1 %v2160_v27  ;;  %v1235_v17 = vpop.permute.xlu1 %1234 }
 0x2ff   : > { %1027 = vadd.xlane.f32.xlu0 %v1026_v45 }
 0x305   : > { %v2510_v35 = vpop.eup %2114 }
 0x306   : > { %v2512_v43 = vpop.eup %2116  ;;  %v1047_v38 = vsel %vm908_vm3, %v2510_v35, 0.0 }
 0x307   : > { %v1038_v51 = vsel %vm908_vm3, %v2512_v43, 0.0 }
 0x30a   : > { %1328 = vrot.lane.b32.xlu1 %v2299_v47, %s2163_s18  ;;  %v1003_v47 = vmul.f32 1.442695, %v972_v59 }
 0x30c   : > { %2118 = vpow2.f32 %v1003_v47 }
 0x315   : > { %1281 = vrot.lane.b32.xlu0 %v2301_v48, %s2163_s18  ;;  %v1035_v48 = vsel %vm908_vm3, %v2506_v57, 0.0 }
 0x316   : > { %v2518_v11 = vpop.eup %2118 }
 0x317   : > { %v1050_v62 = vsel %vm908_vm3, %v2518_v11, 0.0 }
 0x31f   : > { %s2075_s21 = spop %2074 }
 0x32e   : > { %1036 = vadd.xlane.f32.xlu1 %v1035_v48 }
 0x332   : > { %1048 = vadd.xlane.f32.xlu1 %v1047_v38 }
 0x334   : > { %1039 = vadd.xlane.f32.xlu0 %v1038_v51 }
 0x338   : > { %1051 = vadd.xlane.f32.xlu0 %v1050_v62 }
 0x343   : > { %1422 = vrot.lane.b32.xlu1 %v2308_v6, %s2163_s18 }
 0x34e   : > { %1375 = vrot.lane.b32.xlu0 %v2310_v10, %s2163_s18 }
 0x36c   : > { %v1007_v1 = vpop.xlane.xlu1 %1006 }
 0x36d   : > { %2120 = vrcp.f32 %v1007_v1 }
 0x374   : > { %v1031_v2 = vpop.xlane.xlu1 %1030 }
 0x377   : > { %v2121_v53 = vpop.eup %2120 }
 0x378   : > { %v1010_v0 = vpop.xlane.xlu0 %1009  ;;  %v1069_v10 = vmul.f32 %v2121_v53, %v2441_v26 }
 0x379   : > { %2122 = vrcp.f32 %v1010_v0 }
 0x37a   : > { %v1013_v44 = vpop.xlane.xlu1 %1012 }
 0x37b   : > { %2124 = vrcp.f32 %v1013_v44 }
 0x37c   : > { %v1034_v31 = vpop.xlane.xlu0 %1033 }
 0x37e   : > { %v1043_v29 = vpop.xlane.xlu1 %1042 }
 0x380   : > { %v1016_v46 = vpop.xlane.xlu0 %1015 }
 0x381   : > { %2126 = vrcp.f32 %v1016_v46 }
 0x382   : > { %v1019_v6 = vpop.xlane.xlu1 %1018 }
 0x383   : > { %v2123_v42 = vpop.eup %2122  ;;  %2128 = vrcp.f32 %v1019_v6 }
 0x384   : > { %v1070_v33 = vmul.f32 %v2123_v42, %v2455_v56  ;;  %v1046_v36 = vpop.xlane.xlu0 %1045 }
 0x385   : > { %v2125_v49 = vpop.eup %2124 }
 0x386   : > { %v1085_v45 = vpack.c.bf16 %v1070_v33, %v1069_v10  ;;  %v1025_v37 = vpop.xlane.xlu1 %1024  ;;  %v1071_v26 = vmul.f32 %v2125_v49, %v2462_v61 }
 0x388   : > { %2006 = vmatmul.mubr.msk.bf16.vlgmr.msra.gmra.mrb[16].mxu0 %vm908_vm3, %v1085_v45  ;;  %v1022_v41 = vpop.xlane.xlu0 %1021 }
 0x389   : > { %2016 = vmatpush3.bf16.msra.mxu0 %v1188_v28  ;;  %2130 = vrcp.f32 %v1022_v41  ;;  %2017 = vmatprep.mubr.msk.bf16.mxu0 %vm2161_vm2, %v2160_v27 }
 0x38a   : > { %2027 = vmatprep.subr.bf16.mxu0 %v2160_v27  ;;  %2132 = vrcp.f32 %v1025_v37  ;;  %v1329_v1 = vpop.permute.xlu1 %1328 }
 0x38b   : > { %v2127_v60 = vpop.eup %2126  ;;  %2134 = vrcp.f32 %v1034_v31 }
 0x38c   : > { %v1072_v56 = vmul.f32 %v2127_v60, %v2471_v22  ;;  %v1028_v50 = vpop.xlane.xlu0 %1027  ;;  %v2571_v60 = vstv %s2075_s21 }
 0x38d   : > { %2136 = vrcp.f32 %v1028_v50  ;;  %v2129_v52 = vpop.eup %2128 }
 0x38e   : > { %v1086_v54 = vpack.c.bf16 %v1072_v56, %v1071_v26  ;;  %2138 = vrcp.f32 %v1031_v2  ;;  %v1073_v59 = vmul.f32 %v2129_v52, %v2475_v25 }
 0x38f   : > { %2140 = vrcp.f32 %v1046_v36 }
 0x390   : > { %2012 = vmatmul.mubr.msk.bf16.vlgmr.msra.gmra.mrb[32].mxu1 %vm908_vm3, %v1086_v54  ;;  %v1282_v63 = vpop.permute.xlu0 %1281  ;;  %2142 = vrcp.f32 %v1043_v29 }
 0x391   : > { %2022 = vmatpush3.bf16.msra.mxu1 %v1235_v17  ;;  %2023 = vmatprep.mubr.msk.bf16.mxu1 %vm2161_vm2, %v2160_v27 }
 0x392   : > { %2033 = vmatprep.subr.bf16.mxu1 %v2160_v27 }
 0x393   : > { %v2131_v55 = vpop.eup %2130 }
 0x394   : > { %v1074_v61 = vmul.f32 %v2131_v55, %v2487_v32  ;;  %v2133_v47 = vpop.eup %2132 }
 0x395   : > { %v2135_v22 = vpop.eup %2134  ;;  %v1075_v51 = vmul.f32 %v2133_v47, %v2483_v30 }
 0x396   : > { %v1087_v48 = vpack.c.bf16 %v1074_v61, %v1073_v59  ;;  %v1078_v25 = vmul.f32 %v2135_v22, %v2458_v58 }
 0x397   : > { %v2137_v38 = vpop.eup %2136 }
 0x398   : > { %v1076_v62 = vmul.f32 %v2137_v38, %v2493_v34  ;;  %2018 = vmatmul.mubr.msk.bf16.vlgmr.msra.gmra.mrb[20].mxu0 %vm908_vm3, %v1087_v48  ;;  %v2139_v28 = vpop.eup %2138 }
 0x399   : > { %2028 = vmatpush3.bf16.msra.mxu0 %v1282_v63  ;;  %2029 = vmatprep.mubr.msk.bf16.mxu0 %vm2161_vm2, %v2160_v27  ;;  %v1077_v32 = vmul.f32 %v2139_v28, %v2449_v40  ;;  %v2141_v34 = vpop.eup %2140 }
 0x39a   : > { %v1088_v17 = vpack.c.bf16 %v1076_v62, %v1075_v51  ;;  %2039 = vmatprep.subr.bf16.mxu0 %v2160_v27  ;;  %v2143_v44 = vpop.eup %2142  ;;  %v1082_v31 = vmul.f32 %v2141_v34, %v2479_v39 }
 0x39b   : > { %v1089_v30 = vpack.c.bf16 %v1078_v25, %v1077_v32  ;;  %v1081_v46 = vmul.f32 %v2143_v44, %v2466_v15 }
 0x39c   : > { %2024 = vmatmul.mubr.msk.bf16.vlgmr.msra.gmra.mrb[36].mxu1 %vm908_vm3, %v1088_v17 }
 0x39d   : > { %2034 = vmatpush3.bf16.msra.mxu1 %v1329_v1  ;;  %2035 = vmatprep.mubr.msk.bf16.mxu1 %vm2161_vm2, %v2160_v27  ;;  %v1091_v42 = vpack.c.bf16 %v1082_v31, %v1081_v46 }
 0x39e   : > { %2045 = vmatprep.subr.bf16.mxu1 %v2160_v27 }
 0x3a0   : > { %2030 = vmatmul.mubr.msk.bf16.vlgmr.msra.gmra.mrb[24].mxu0 %vm908_vm3, %v1089_v30 }
 0x3a1   : > { %2041 = vmatprep.mubr.msk.bf16.mxu0 %vm2161_vm2, %v2160_v27 }
 0x3bb   : > { %v1037_v58 = vpop.xlane.xlu1 %1036 }
 0x3bc   : > { %2144 = vrcp.f32 %v1037_v58 }
 0x3bf   : > { %v1049_v2 = vpop.xlane.xlu1 %1048 }
 0x3c1   : > { %v1040_v40 = vpop.xlane.xlu0 %1039 }
 0x3c2   : > { %2146 = vrcp.f32 %v1040_v40 }
 0x3c3   : > { %v1423_v37 = vpop.permute.xlu1 %1422 }
 0x3c5   : > { %v1052_v0 = vpop.xlane.xlu0 %1051 }
 0x3c6   : > { %2148 = vrcp.f32 %v1052_v0  ;;  %v2145_v6 = vpop.eup %2144 }
 0x3c7   : > { %2150 = vrcp.f32 %v1049_v2  ;;  %v1079_v29 = vmul.f32 %v2145_v6, %v2506_v57  ;;  %v1528_v57 = vld [vmem:[%s2723_s5] sm:$0xf] }
 0x3c9   : > { %v1376_v53 = vpop.permute.xlu0 %1375 }
 0x3ca   : > { %2040 = vmatpush3.bf16.msra.mxu0 %v1376_v53 }
 0x3cb   : > { %2073 = vmatprep.subr.msk.bf16.mxu0 %vm399_vm0, %v1528_v57 }
 0x3cc   : > { %v2147_v10 = vpop.eup %2146 }
 0x3cd   : > { %v1080_v33 = vmul.f32 %v2147_v10, %v2512_v43  ;;  %2042 = vmatmul.mubr.msk.bf16.vlgmr.msra.gmra.mrb[28].mxu0 %vm908_vm3, %v1091_v42  ;;  %v1554_v43 = vsel %vm399_vm0, %v1528_v57, 0 }
 0x3ce   : > { %2052 = vmatpush3.bf16.msra.mxu0 %v1554_v43 }
 0x3cf   : > { %v1090_v36 = vpack.c.bf16 %v1080_v33, %v1079_v29 }
 0x3d0   : > { %v2149_v45 = vpop.eup %2148 }
 0x3d1   : > { %2036 = vmatmul.mubr.msk.bf16.vlgmr.msra.gmra.mrb[40].mxu1 %vm908_vm3, %v1090_v36  ;;  %v2151_v39 = vpop.eup %2150  ;;  %v1084_v15 = vmul.f32 %v2149_v45, %v2518_v11 }
 0x3d2   : > { %2046 = vmatpush3.bf16.msra.mxu1 %v1423_v37  ;;  %2047 = vmatprep.mubr.msk.bf16.mxu1 %vm2161_vm2, %v2160_v27  ;;  %v1083_v41 = vmul.f32 %v2151_v39, %v2510_v35 }
 0x3d4   : > { %v1092_v49 = vpack.c.bf16 %v1084_v15, %v1083_v41 }
 0x3d9   : > { %2048 = vmatmul.mubr.msk.bf16.vlgmr.msra.gmra.mrb[44].mxu1 %vm908_vm3, %v1092_v49 }
 0x45b   : > { %v1133_v27 = vpop.f32.mrb[16].mxu0 }
 0x45c   : > { %v1472_v11 = vmul.f32 %v2571_v60, %v1133_v27  ;;  %v2007_v26 = vpop.f32.mrb[17].mxu0 }
 0x45d   : > { %v1136_v35 = vpop.f32.mrb[18].mxu0 }
 0x45e   : > { %v1488_v56 = vadd.f32 %v1472_v11, %v2232_v3  ;;  %v1473_v50 = vmul.f32 %v2571_v60, %v1136_v35  ;;  %v2008_v54 = vpop.f32.mrb[19].mxu0 }
 0x460   : > { %v1489_v52 = vadd.f32 %v1473_v50, %v2234_v4  ;;  %v1504_v55 = vmax.f32 %v1488_v56, 0.0 }
 0x462   : > { %v1505_v59 = vmax.f32 %v1489_v52, 0.0 }
 0x463   : > { %v1180_v61 = vpop.f32.mrb[32].mxu1 }
 0x464   : > { %v1520_v47 = vpack.c.bf16 %v1505_v59, %v1504_v55  ;;  %v1474_v22 = vmul.f32 %v2571_v60, %v1180_v61  ;;  %v2013_v48 = vpop.f32.mrb[33].mxu1 }
 0x465   : > { %v1183_v38 = vpop.f32.mrb[34].mxu1 }
 0x466   : > { %v1490_v51 = vadd.f32 %v1474_v22, %v2236_v5  ;;  %v1475_v62 = vmul.f32 %v2571_v60, %v1183_v38  ;;  %v2014_v63 = vpop.f32.mrb[35].mxu1  ;;  %2053 = vmatprep.mubr.msk.bf16.mxu0 %vm374_vm1, %v1520_v47 }
 0x468   : > { %v1491_v3 = vadd.f32 %v1475_v62, %v2240_v7  ;;  %v1506_v28 = vmax.f32 %v1490_v51, 0.0 }
 0x46a   : > { %v1507_v25 = vmax.f32 %v1491_v3, 0.0 }
 0x46b   : > { %v1227_v4 = vpop.f32.mrb[20].mxu0 }
 0x46c   : > { %v1521_v17 = vpack.c.bf16 %v1507_v25, %v1506_v28  ;;  %v1476_v32 = vmul.f32 %v2571_v60, %v1227_v4  ;;  %v2019_v1 = vpop.f32.mrb[21].mxu0 }
 0x46d   : > { %v1230_v30 = vpop.f32.mrb[22].mxu0 }
 0x46e   : > { %v1492_v58 = vadd.f32 %v1476_v32, %v2254_v14  ;;  %v1477_v40 = vmul.f32 %v2571_v60, %v1230_v30  ;;  %v2020_v5 = vpop.f32.mrb[23].mxu0  ;;  %2054 = vmatmul.mubr.msk.bf16.vlgmr.msra.gmra.mrb[32].mxu0 %vm374_vm1, %v1521_v17 }
 0x46f   : > { %v1274_v34 = vpop.f32.mrb[36].mxu1 }
 0x470   : > { %v1493_v2 = vadd.f32 %v1477_v40, %v2259_v16  ;;  %v1478_v7 = vmul.f32 %v2571_v60, %v1274_v34  ;;  %v2025_v0 = vpop.f32.mrb[37].mxu1  ;;  %v1508_v31 = vmax.f32 %v1492_v58, 0.0  ;;  %v2616_v40 = vld [vmem:[%s2724_s6] ss:$0 sm:$0xff]  ;;  %v1701_v34 = vld [vmem:[%s2622_s26 + $0x10] sm:$0xff] }
 0x471   : > { %v1277_v44 = vpop.f32.mrb[38].mxu1 }
 0x472   : > { %v1509_v46 = vmax.f32 %v1493_v2, 0.0  ;;  %v1494_v53 = vadd.f32 %v1478_v7, %v2270_v20  ;;  %v1479_v6 = vmul.f32 %v2571_v60, %v1277_v44  ;;  %v2026_v42 = vpop.f32.mrb[39].mxu1  ;;  %v1699_v44 = vld [vmem:[%s2622_s26] sm:$0xff] }
 0x473   : > { %v1321_v14 = vpop.f32.mrb[24].mxu0 }
 0x474   : > { %v1522_v10 = vpack.c.bf16 %v1509_v46, %v1508_v31  ;;  %v1495_v29 = vadd.f32 %v1479_v6, %v2272_v21  ;;  %v1480_v33 = vmul.f32 %v2571_v60, %v1321_v14  ;;  %v2031_v36 = vpop.f32.mrb[25].mxu0  ;;  %v1510_v16 = vmax.f32 %v1494_v53, 0.0  ;;  %v1702_v6 = vld [vmem:[%s2622_s26 + $0x18] sm:$0xff] }
 0x475   : > { %v1324_v45 = vpop.f32.mrb[26].mxu0 }
 0x476   : > { %v1511_v37 = vmax.f32 %v1495_v29, 0.0  ;;  %v1496_v39 = vadd.f32 %v1480_v33, %v2242_v8  ;;  %v1481_v15 = vmul.f32 %v2571_v60, %v1324_v45  ;;  %v2032_v41 = vpop.f32.mrb[27].mxu0  ;;  %2057 = vmatprep.mubr.msk.bf16.mxu0 %vm374_vm1, %v1522_v10  ;;  %v1700_v29 = vld [vmem:[%s2622_s26 + $0x8] sm:$0xff] }
 0x478   : > { %v1523_v20 = vpack.c.bf16 %v1511_v37, %v1510_v16  ;;  %v1497_v49 = vadd.f32 %v1481_v15, %v2244_v9  ;;  %v1512_v57 = vmax.f32 %v1496_v39, 0.0 }
 0x47a   : > { %v1513_v43 = vmax.f32 %v1497_v49, 0.0  ;;  %2058 = vmatmul.mubr.msk.bf16.gmra.mrb[36].mxu0 %vm374_vm1, %v1523_v20 }
 0x47c   : > { %v1524_v21 = vpack.c.bf16 %v1513_v43, %v1512_v57  ;;  %v1705_v43 = vld [vmem:[%s2622_s26 + $0x30] sm:$0xff] }
 0x47e   : > { %2061 = vmatprep.mubr.msk.bf16.mxu0 %vm374_vm1, %v1524_v21 }
 0x4a0   : > { %v1415_v27 = vpop.f32.mrb[28].mxu0 }
 0x4a1   : > { %v1484_v11 = vmul.f32 %v2571_v60, %v1415_v27  ;;  %v2043_v26 = vpop.f32.mrb[29].mxu0 }
 0x4a2   : > { %v1418_v8 = vpop.f32.mrb[30].mxu0  ;;  %v1703_v26 = vld [vmem:[%s2622_s26 + $0x20] sm:$0xff] }
 0x4a3   : > { %v1500_v35 = vadd.f32 %v1484_v11, %v2265_v18  ;;  %v1485_v56 = vmul.f32 %v2571_v60, %v1418_v8  ;;  %v2044_v50 = vpop.f32.mrb[31].mxu0 }
 0x4a4   : > { %v1368_v54 = vpop.f32.mrb[40].mxu1  ;;  %v1706_v50 = vld [vmem:[%s2622_s26 + $0x38] sm:$0xff] }
 0x4a5   : > { %v1501_v9 = vadd.f32 %v1485_v56, %v2267_v19  ;;  %v1482_v52 = vmul.f32 %v2571_v60, %v1368_v54  ;;  %v2037_v55 = vpop.f32.mrb[41].mxu1  ;;  %v1516_v61 = vmax.f32 %v1500_v35, 0.0 }
 0x4a6   : > { %v1371_v59 = vpop.f32.mrb[42].mxu1  ;;  %v1704_v55 = vld [vmem:[%s2622_s26 + $0x28] sm:$0xff] }
 0x4a7   : > { %v1517_v47 = vmax.f32 %v1501_v9, 0.0  ;;  %v1498_v22 = vadd.f32 %v1482_v52, %v2250_v12  ;;  %v1483_v48 = vmul.f32 %v2571_v60, %v1371_v59  ;;  %v2038_v38 = vpop.f32.mrb[43].mxu1 }
 0x4a9   : > { %v1526_v51 = vpack.c.bf16 %v1517_v47, %v1516_v61  ;;  %v1499_v18 = vadd.f32 %v1483_v48, %v2252_v13  ;;  %v1514_v62 = vmax.f32 %v1498_v22, 0.0 }
 0x4ab   : > { %v1515_v63 = vmax.f32 %v1499_v18, 0.0 }
 0x4ac   : > { %v1462_v3 = vpop.f32.mrb[44].mxu1 }
 0x4ad   : > { %v1525_v28 = vpack.c.bf16 %v1515_v63, %v1514_v62  ;;  %v1486_v19 = vmul.f32 %v2571_v60, %v1462_v3  ;;  %v2049_v25 = vpop.f32.mrb[45].mxu1 }
 0x4ae   : > { %v1465_v4 = vpop.f32.mrb[46].mxu1 }
 0x4af   : > { %v1502_v17 = vadd.f32 %v1486_v19, %v2277_v23  ;;  %v1487_v32 = vmul.f32 %v2571_v60, %v1465_v4  ;;  %v2050_v12 = vpop.f32.mrb[47].mxu1  ;;  %2062 = vmatmul.mubr.msk.bf16.gmra.mrb[40].mxu0 %vm374_vm1, %v1525_v28  ;;  %v1709_v28 = vld [vmem:[%s2622_s26 + $0x50] sm:$0xff] }
 0x4b0   : > { %2065 = vmatprep.mubr.msk.bf16.mxu0 %vm374_vm1, %v1526_v51 }
 0x4b1   : > { %v1503_v13 = vadd.f32 %v1487_v32, %v2279_v24  ;;  %v1518_v1 = vmax.f32 %v1502_v17, 0.0  ;;  %v2627_v24 = vld [vmem:[%s2725_s7] ss:$0 sm:$0xff] }
 0x4b2   : > { %v1707_v17 = vld [vmem:[%s2622_s26 + $0x40] sm:$0xff] }
 0x4b3   : > { %v1519_v30 = vmax.f32 %v1503_v13, 0.0 }
 0x4b5   : > { %v1527_v58 = vpack.c.bf16 %v1519_v30, %v1518_v1  ;;  %v1710_v1 = vld [vmem:[%s2622_s26 + $0x58] sm:$0xff] }
 0x4b7   : > { %2066 = vmatmul.mubr.msk.bf16.gmra.mrb[44].mxu0 %vm374_vm1, %v1527_v58 }
 0x541   : > { %v2055_v23 = vpop.f32.mrb[32].mxu0 }
 0x542   : > { %v1662_v60 = vmul.f32 %v2055_v23, %v2616_v40  ;;  %v1590_v5 = vpop.f32.mrb[33].mxu0 }
 0x543   : > { %v1660_v2 = vmul.f32 %v2616_v40, %v1590_v5  ;;  %v2056_v7 = vpop.f32.mrb[34].mxu0 }
 0x544   : > { %v1685_v0 = vadd.f32 %v2627_v24, %v1662_v60  ;;  %v1663_v31 = vmul.f32 %v2056_v7, %v2616_v40  ;;  %v1593_v46 = vpop.f32.mrb[35].mxu0  ;;  %v1708_v60 = vld [vmem:[%s2622_s26 + $0x48] sm:$0xff] }
 0x545   : > { %v1683_v53 = vadd.f32 %v2627_v24, %v1660_v2  ;;  %v1661_v42 = vmul.f32 %v2616_v40, %v1593_v46 }
 0x546   : > { %v1717_v14 = vadd.f32 %v1701_v34, %v1685_v0  ;;  %v1686_v10 = vadd.f32 %v2627_v24, %v1663_v31 }
 0x547   : > { %v1715_v33 = vadd.f32 %v1699_v44, %v1683_v53  ;;  %v1684_v36 = vadd.f32 %v2627_v24, %v1661_v42 }
 0x548   : > { %v1733_v45 = vmax.f32 %v1717_v14, 0.0  ;;  %v1718_v16 = vadd.f32 %v1702_v6, %v1686_v10  ;;  %v1713_v14 = vld [vmem:[%s2622_s26 + $0x70] sm:$0xff] }
 0x549   : > { %v1731_v37 = vmax.f32 %v1715_v33, 0.0  ;;  %v1716_v39 = vadd.f32 %v1700_v29, %v1684_v36  ;;  %v1711_v36 = vld [vmem:[%s2622_s26 + $0x60] sm:$0xff] }
 0x54a   : > { %1749 = vst.msk [vmem:[%s2644_s10 + $0x10] sm:$0xff] %vm908_vm3, %v1733_v45  ;;  %v1734_v15 = vmax.f32 %v1718_v16, 0.0 }
 0x54b   : > { %1747 = vst.msk [vmem:[%s2644_s10] sm:$0xff] %vm908_vm3, %v1731_v37  ;;  %v1732_v41 = vmax.f32 %v1716_v39, 0.0  ;;  %v1714_v39 = vld [vmem:[%s2622_s26 + $0x78] sm:$0xff] }
 0x54c   : > { %1750 = vst.msk [vmem:[%s2644_s10 + $0x18] sm:$0xff] %vm908_vm3, %v1734_v15 }
 0x54d   : > { %1748 = vst.msk [vmem:[%s2644_s10 + $0x8] sm:$0xff] %vm908_vm3, %v1732_v41  ;;  %v2059_v20 = vpop.f32.mrb[36].mxu0 }
 0x54e   : > { %v1666_v49 = vmul.f32 %v2059_v20, %v2616_v40  ;;  %v1606_v57 = vpop.f32.mrb[37].mxu0 }
 0x54f   : > { %v1664_v21 = vmul.f32 %v2616_v40, %v1606_v57  ;;  %v2060_v27 = vpop.f32.mrb[38].mxu0 }
 0x550   : > { %v1689_v11 = vadd.f32 %v2627_v24, %v1666_v49  ;;  %v1667_v8 = vmul.f32 %v2060_v27, %v2616_v40  ;;  %v1609_v35 = vpop.f32.mrb[39].mxu0  ;;  %v1712_v49 = vld [vmem:[%s2622_s26 + $0x68] sm:$0xff] }
 0x551   : > { %v1687_v56 = vadd.f32 %v2627_v24, %v1664_v21  ;;  %v1665_v54 = vmul.f32 %v2616_v40, %v1609_v35 }
 0x552   : > { %v1721_v9 = vadd.f32 %v1705_v43, %v1689_v11  ;;  %v1690_v52 = vadd.f32 %v2627_v24, %v1667_v8 }
 0x553   : > { %v1719_v59 = vadd.f32 %v1703_v26, %v1687_v56  ;;  %v1688_v61 = vadd.f32 %v2627_v24, %v1665_v54 }
 0x554   : > { %v1737_v47 = vmax.f32 %v1721_v9, 0.0  ;;  %v1722_v22 = vadd.f32 %v1706_v50, %v1690_v52 }
 0x555   : > { %v1735_v48 = vmax.f32 %v1719_v59, 0.0  ;;  %v1720_v38 = vadd.f32 %v1704_v55, %v1688_v61 }
 0x556   : > { %1753 = vst.msk [vmem:[%s2644_s10 + $0x30] sm:$0xff] %vm908_vm3, %v1737_v47  ;;  %v1738_v51 = vmax.f32 %v1722_v22, 0.0 }
 0x557   : > { %1751 = vst.msk [vmem:[%s2644_s10 + $0x20] sm:$0xff] %vm908_vm3, %v1735_v48  ;;  %v1736_v18 = vmax.f32 %v1720_v38, 0.0 }
 0x558   : > { %1754 = vst.msk [vmem:[%s2644_s10 + $0x38] sm:$0xff] %vm908_vm3, %v1738_v51 }
 0x559   : > { %1752 = vst.msk [vmem:[%s2644_s10 + $0x28] sm:$0xff] %vm908_vm3, %v1736_v18 }
 0x582   : > { %v2063_v62 = vpop.f32.mrb[40].mxu0 }
 0x583   : > { %v1670_v63 = vmul.f32 %v2063_v62, %v2616_v40  ;;  %v1622_v3 = vpop.f32.mrb[41].mxu0 }
 0x584   : > { %v1668_v19 = vmul.f32 %v2616_v40, %v1622_v3  ;;  %v2064_v25 = vpop.f32.mrb[42].mxu0 }
 0x585   : > { %v1693_v4 = vadd.f32 %v2627_v24, %v1670_v63  ;;  %v1671_v32 = vmul.f32 %v2064_v25, %v2616_v40  ;;  %v1625_v12 = vpop.f32.mrb[43].mxu0 }
 0x586   : > { %v1691_v13 = vadd.f32 %v2627_v24, %v1668_v19  ;;  %v1669_v30 = vmul.f32 %v2616_v40, %v1625_v12 }
 0x587   : > { %v1725_v58 = vadd.f32 %v1709_v28, %v1693_v4  ;;  %v1694_v23 = vadd.f32 %v2627_v24, %v1671_v32 }
 0x588   : > { %v1723_v5 = vadd.f32 %v1707_v17, %v1691_v13  ;;  %v1692_v34 = vadd.f32 %v2627_v24, %v1669_v30 }
 0x589   : > { %v1741_v2 = vmax.f32 %v1725_v58, 0.0  ;;  %v1726_v7 = vadd.f32 %v1710_v1, %v1694_v23 }
 0x58a   : > { %v1739_v0 = vmax.f32 %v1723_v5, 0.0  ;;  %v1724_v44 = vadd.f32 %v1708_v60, %v1692_v34  ;;  %v2067_v31 = vpop.f32.mrb[44].mxu0 }
 0x58b   : > { %1757 = vst.msk [vmem:[%s2644_s10 + $0x50] sm:$0xff] %vm908_vm3, %v1741_v2  ;;  %v1742_v46 = vmax.f32 %v1726_v7, 0.0  ;;  %v1674_v53 = vmul.f32 %v2067_v31, %v2616_v40  ;;  %v1638_v6 = vpop.f32.mrb[45].mxu0 }
 0x58c   : > { %1755 = vst.msk [vmem:[%s2644_s10 + $0x40] sm:$0xff] %vm908_vm3, %v1739_v0  ;;  %v1740_v42 = vmax.f32 %v1724_v44, 0.0  ;;  %v1672_v10 = vmul.f32 %v2616_v40, %v1638_v6  ;;  %v2068_v29 = vpop.f32.mrb[46].mxu0 }
 0x58d   : > { %1758 = vst.msk [vmem:[%s2644_s10 + $0x58] sm:$0xff] %vm908_vm3, %v1742_v46  ;;  %v1697_v33 = vadd.f32 %v2627_v24, %v1674_v53  ;;  %v1675_v45 = vmul.f32 %v2068_v29, %v2616_v40  ;;  %v1641_v16 = vpop.f32.mrb[47].mxu0 }
 0x58e   : > { %1756 = vst.msk [vmem:[%s2644_s10 + $0x48] sm:$0xff] %vm908_vm3, %v1740_v42  ;;  %v1695_v37 = vadd.f32 %v2627_v24, %v1672_v10  ;;  %v1673_v15 = vmul.f32 %v2616_v40, %v1641_v16 }
 0x58f   : > { %v1729_v41 = vadd.f32 %v1713_v14, %v1697_v33  ;;  %v1698_v20 = vadd.f32 %v2627_v24, %v1675_v45 }
 0x590   : > { %v1727_v57 = vadd.f32 %v1711_v36, %v1695_v37  ;;  %v1696_v43 = vadd.f32 %v2627_v24, %v1673_v15 }
 0x591   : > { %v1745_v21 = vmax.f32 %v1729_v41, 0.0  ;;  %v1730_v27 = vadd.f32 %v1714_v39, %v1698_v20 }
 0x592   : > { %v1743_v11 = vmax.f32 %v1727_v57, 0.0  ;;  %v1728_v26 = vadd.f32 %v1712_v49, %v1696_v43 }
 0x593   : > { %1761 = vst.msk [vmem:[%s2644_s10 + $0x70] sm:$0xff] %vm908_vm3, %v1745_v21  ;;  %v1746_v8 = vmax.f32 %v1730_v27, 0.0 }
 0x594   : > { %1759 = vst.msk [vmem:[%s2644_s10 + $0x60] sm:$0xff] %vm908_vm3, %v1743_v11  ;;  %v1744_v35 = vmax.f32 %v1728_v26, 0.0 }
 0x595   : > { %1762 = vst.msk [vmem:[%s2644_s10 + $0x78] sm:$0xff] %vm908_vm3, %v1746_v8 }
 0x596   : > { %1760 = vst.msk [vmem:[%s2644_s10 + $0x68] sm:$0xff] %vm908_vm3, %v1744_v35 }
 0x597 PF: > { %s20_s29 = sadd.s32 1, %s2158_s29  }
 0x598   : > { %p17_p4 = scmp.ge.s32.totalorder %s20_s29, 6  }
 0x59a   :  { %19 = sbr.rel (!%p17_p4) target bundleno = 3 (0x3), region = 85 }

</bundles_post_ra>
